<compile_context>
chip_gen: v5e
topology: v5e:2x2
jax: 0.10.0
libtpu: 0.0.40
codegen_flags: <defaults>
</compile_context>

<pallas_src>
import jax
import jax.numpy as jnp
from jax.experimental import pallas as pl
from jax.experimental.pallas import tpu as pltpu

HIDDEN = 256


def _double_value_kernel(x_ref, w14_ref, w2_ref, w36_ref, bias_ref, out_ref):
    # Fused layer 1 for both heads: (B, S) @ (S, 512) -> (B, 512), f32 accumulate.
    x = x_ref[...].astype(jnp.bfloat16)
    h_all = jnp.dot(x, w14_ref[...], preferred_element_type=jnp.float32)
    h_all = jnp.maximum(h_all + bias_ref[:, 0:2 * HIDDEN], 0.0)

    if w2_ref.ndim == 2:
        # v7x path: block-diagonal fused layer 2, one (B,512)@(512,512) dot.
        h2_all = jnp.dot(h_all.astype(jnp.bfloat16), w2_ref[...],
                         preferred_element_type=jnp.float32)
        h2_all = jnp.maximum(h2_all + bias_ref[:, 2 * HIDDEN:4 * HIDDEN], 0.0)
    else:
        # v5e/v6e path: per-head (256,256) dots on 256-lane-aligned slices.
        h = h_all[:, :HIDDEN].astype(jnp.bfloat16)
        g = h_all[:, HIDDEN:].astype(jnp.bfloat16)
        h2 = jnp.maximum(
            jnp.dot(h, w2_ref[0], preferred_element_type=jnp.float32)
            + bias_ref[:, 2 * HIDDEN:3 * HIDDEN], 0.0)
        g2 = jnp.maximum(
            jnp.dot(g, w2_ref[1], preferred_element_type=jnp.float32)
            + bias_ref[:, 3 * HIDDEN:4 * HIDDEN], 0.0)
        # Concat at a 256-lane boundary: free at the vreg level.
        h2_all = jnp.concatenate([h2, g2], axis=1)

    # Final layer: one (B,512)@(512,2) block dot -> lane-dense (B,2) output
    # (col 0 = v1, col 1 = v2).
    v = (jnp.dot(h2_all.astype(jnp.bfloat16), w36_ref[...],
                 preferred_element_type=jnp.float32)
         + bias_ref[:, 4 * HIDDEN:4 * HIDDEN + 2])
    out_ref[...] = v.astype(out_ref.dtype)


def prepare_params(params, fuse_layer2=None):
    """One-time, host-side packing (call OUTSIDE jit, at param-load time).

    PyTorch nn.Linear stores (out, in); we transpose to (in, out), fuse the
    two heads' layer-1 weights, pack layer-2 per chip generation, block-stack
    the two (256,1) output heads into one (512,2) weight, pack every bias
    into one (1, 1026) f32 slab, and cast MXU inputs to bf16.

    NOTE: weights are permanently quantized to bf16 here (MXU-native input,
    halves weight DMA).  Accumulation stays f32; parity with an f32 PyTorch
    module is ~1e-2 relative -- an explicit design decision for a value head.
    """
    if fuse_layer2 is None:
        kind = jax.devices()[0].device_kind.lower()
        fuse_layer2 = "v7" in kind  # block-diag layer-2 fusion pays on v7x only

    f32, bf16 = jnp.float32, jnp.bfloat16

    # Layer 1 (fused heads): (S, 512).
    w1t = jnp.asarray(params["l1.weight"], f32).T
    w4t = jnp.asarray(params["l4.weight"], f32).T
    w14 = jnp.concatenate([w1t, w4t], axis=1).astype(bf16)

    # Layer 2.
    w2t = jnp.asarray(params["l2.weight"], f32).T
    w5t = jnp.asarray(params["l5.weight"], f32).T
    if fuse_layer2:
        z = jnp.zeros((HIDDEN, HIDDEN), f32)
        w2 = jnp.concatenate(
            [jnp.concatenate([w2t, z], axis=1),
             jnp.concatenate([z, w5t], axis=1)], axis=0).astype(bf16)   # (512,512)
    else:
        w2 = jnp.stack([w2t, w5t]).astype(bf16)                          # (2,256,256)

    # Final layer: (512, 2) block matrix [[w3, 0], [0, w6]].
    w3 = jnp.asarray(params["l3.weight"], f32).T                         # (256, 1)
    w6 = jnp.asarray(params["l6.weight"], f32).T                         # (256, 1)
    zcol = jnp.zeros((HIDDEN, 1), f32)
    w36 = jnp.concatenate(
        [jnp.concatenate([w3, zcol], axis=1),
         jnp.concatenate([zcol, w6], axis=1)], axis=0).astype(bf16)      # (512, 2)

    # Single bias slab: [b1 | b4 | b2 | b5 | b3 | b6] -> (1, 1026) f32.
    bias = jnp.concatenate([
        jnp.asarray(params["l1.bias"], f32), jnp.asarray(params["l4.bias"], f32),
        jnp.asarray(params["l2.bias"], f32), jnp.asarray(params["l5.bias"], f32),
        jnp.asarray(params["l3.bias"], f32), jnp.asarray(params["l6.bias"], f32),
    ]).reshape(1, 4 * HIDDEN + 2)

    return dict(w14=w14, w2=w2, w36=w36, bias=bias)


def double_value_net(state, packed):
    """state: [B, state_dim] f32; packed: output of prepare_params.

    Returns a lane-dense [B, 2] f32 slab: column 0 = v1, column 1 = v2.
    Slice into (v1, v2) at the consumer (outside the jit) if needed.
    """
    B, state_dim = state.shape

    if packed["w2"].ndim == 2:
        l2_flops = 2 * B * (2 * HIDDEN) * (2 * HIDDEN)
    else:
        l2_flops = 2 * (2 * B * HIDDEN * HIDDEN)
    flops = (2 * B * state_dim * (2 * HIDDEN)      # fused layer 1
             + l2_flops                            # layer 2
             + 2 * B * (2 * HIDDEN) * 2)           # final block dot
    bytes_accessed = (state.size * state.dtype.itemsize
                      + sum(v.size * v.dtype.itemsize for v in packed.values())
                      + B * 2 * 4)

    vmem = pl.BlockSpec(memory_space=pltpu.VMEM)
    return pl.pallas_call(
        _double_value_kernel,
        out_shape=jax.ShapeDtypeStruct((B, 2), jnp.float32),
        in_specs=[vmem] * 5,
        out_specs=vmem,
        cost_estimate=pl.CostEstimate(
            flops=flops, transcendentals=0, bytes_accessed=bytes_accessed),
    )(state, packed["w14"], packed["w2"], packed["w36"], packed["bias"])


def _init_params(key, state_dim):
    """Deterministic init matching nn.Linear shapes (Kaiming-uniform-ish)."""
    dims = [
        (256, state_dim), (256, 256), (1, 256),   # l1, l2, l3
        (256, state_dim), (256, 256), (1, 256),   # l4, l5, l6
    ]
    params = {}
    for i, (out_f, in_f) in enumerate(dims, start=1):
        key, kw, kb = jax.random.split(key, 3)
        bound = 1.0 / jnp.sqrt(jnp.float32(in_f))
        params[f"l{i}.weight"] = jax.random.uniform(
            kw, (out_f, in_f), jnp.float32, -bound, bound)
        params[f"l{i}.bias"] = jax.random.uniform(
            kb, (out_f,), jnp.float32, -bound, bound)
    return params


def _reference(state, params):
    """Pure-JAX reference emulating the kernel's bf16-input / f32-accumulate math."""
    def bf(a):
        return a.astype(jnp.bfloat16).astype(jnp.float32)

    def head(x, i1, i2, i3):
        h = jnp.maximum(bf(x) @ bf(params[f"l{i1}.weight"].T) + params[f"l{i1}.bias"], 0.0)
        h = jnp.maximum(bf(h) @ bf(params[f"l{i2}.weight"].T) + params[f"l{i2}.bias"], 0.0)
        return bf(h) @ bf(params[f"l{i3}.weight"].T) + params[f"l{i3}.bias"]

    return head(state, 1, 2, 3), head(state, 4, 5, 6)


if __name__ == "__main__":
    key = jax.random.PRNGKey(0)
    state_dim = 16
    batch = 128   # review: batch >= 128 amortizes launch + weight-DMA fixed cost

    kp, kx = jax.random.split(key)
    params = _init_params(kp, state_dim)
    state = jax.random.normal(kx, (batch, state_dim), jnp.float32)

    # One-time packing at "load time" -- deliberately outside jit.
    packed = prepare_params(params)

    fwd = jax.jit(double_value_net)
    v12 = fwd(state, packed)
    jax.block_until_ready(v12)

    # Consumer-side split (outside the jitted kernel call).
    v1, v2 = v12[:, 0:1], v12[:, 1:2]

    r1, r2 = _reference(state, params)
    assert v12.shape == (batch, 2)
    assert jnp.allclose(v1, r1, atol=2e-3, rtol=2e-3), float(jnp.max(jnp.abs(v1 - r1)))
    assert jnp.allclose(v2, r2, atol=2e-3, rtol=2e-3), float(jnp.max(jnp.abs(v2 - r2)))

    print("KERNEL_OK")
</pallas_src>

<mosaic_0001>
module attributes {stable_mosaic.version = 11 : i64} {
  func.func @_double_value_kernel(%arg0: memref<128x16xf32, #tpu.memory_space<vmem>>, %arg1: memref<16x512xbf16, #tpu.memory_space<vmem>>, %arg2: memref<2x256x256xbf16, #tpu.memory_space<vmem>>, %arg3: memref<512x2xbf16, #tpu.memory_space<vmem>>, %arg4: memref<1x1026xf32, #tpu.memory_space<vmem>>, %arg5: memref<128x2xf32, #tpu.memory_space<vmem>>) attributes {dimension_semantics = [], scalar_prefetch = 0 : i64, scratch_operands = 0 : i64, tpu.core_type = #tpu.core_type<tc>} {
    %c0 = arith.constant 0 : index
    %c0_0 = arith.constant 0 : index
    %0 = vector.load %arg0[%c0, %c0_0] : memref<128x16xf32, #tpu.memory_space<vmem>>, vector<128x16xf32>
    %1 = arith.truncf %0 : vector<128x16xf32> to vector<128x16xbf16>
    %c0_1 = arith.constant 0 : index
    %c0_2 = arith.constant 0 : index
    %2 = vector.load %arg1[%c0_1, %c0_2] : memref<16x512xbf16, #tpu.memory_space<vmem>>, vector<16x512xbf16>
    %cst = arith.constant dense<0.000000e+00> : vector<128x512xf32>
    %3 = tpu.matmul %1, %2, %cst {dimension_numbers = #tpu.dot_dimension_numbers<[1], [0], [0], [1], [0, 0, 1, 1], [], []>} : vector<128x16xbf16>, vector<16x512xbf16>, vector<128x512xf32> -> vector<128x512xf32>
    %c0_3 = arith.constant 0 : index
    %c0_4 = arith.constant 0 : index
    %4 = vector.load %arg4[%c0_3, %c0_4] : memref<1x1026xf32, #tpu.memory_space<vmem>>, vector<1x512xf32>
    %5 = vector.broadcast %4 : vector<1x512xf32> to vector<128x512xf32>
    %6 = arith.addf %3, %5 : vector<128x512xf32>
    %cst_5 = arith.constant 0.000000e+00 : f32
    %7 = vector.broadcast %cst_5 : f32 to vector<128x512xf32>
    %8 = arith.maximumf %6, %7 : vector<128x512xf32>
    %9 = vector.extract_strided_slice %8 {offsets = [0, 0], sizes = [128, 256], strides = [1, 1]} : vector<128x512xf32> to vector<128x256xf32>
    %10 = arith.truncf %9 : vector<128x256xf32> to vector<128x256xbf16>
    %11 = vector.extract_strided_slice %8 {offsets = [0, 256], sizes = [128, 256], strides = [1, 1]} : vector<128x512xf32> to vector<128x256xf32>
    %12 = arith.truncf %11 : vector<128x256xf32> to vector<128x256xbf16>
    %c0_6 = arith.constant 0 : index
    %c0_7 = arith.constant 0 : index
    %c0_8 = arith.constant 0 : index
    %13 = vector.load %arg2[%c0_6, %c0_7, %c0_8] : memref<2x256x256xbf16, #tpu.memory_space<vmem>>, vector<1x256x256xbf16>
    %14 = vector.shape_cast %13 : vector<1x256x256xbf16> to vector<256x256xbf16>
    %cst_9 = arith.constant dense<0.000000e+00> : vector<128x256xf32>
    %15 = tpu.matmul %10, %14, %cst_9 {dimension_numbers = #tpu.dot_dimension_numbers<[1], [0], [0], [1], [0, 0, 1, 1], [], []>} : vector<128x256xbf16>, vector<256x256xbf16>, vector<128x256xf32> -> vector<128x256xf32>
    %c0_10 = arith.constant 0 : index
    %c512 = arith.constant 512 : index
    %16 = vector.load %arg4[%c0_10, %c512] : memref<1x1026xf32, #tpu.memory_space<vmem>>, vector<1x256xf32>
    %17 = vector.broadcast %16 : vector<1x256xf32> to vector<128x256xf32>
    %18 = arith.addf %15, %17 : vector<128x256xf32>
    %cst_11 = arith.constant 0.000000e+00 : f32
    %19 = vector.broadcast %cst_11 : f32 to vector<128x256xf32>
    %20 = arith.maximumf %18, %19 : vector<128x256xf32>
    %c1 = arith.constant 1 : index
    %c0_12 = arith.constant 0 : index
    %c0_13 = arith.constant 0 : index
    %21 = vector.load %arg2[%c1, %c0_12, %c0_13] : memref<2x256x256xbf16, #tpu.memory_space<vmem>>, vector<1x256x256xbf16>
    %22 = vector.shape_cast %21 : vector<1x256x256xbf16> to vector<256x256xbf16>
    %cst_14 = arith.constant dense<0.000000e+00> : vector<128x256xf32>
    %23 = tpu.matmul %12, %22, %cst_14 {dimension_numbers = #tpu.dot_dimension_numbers<[1], [0], [0], [1], [0, 0, 1, 1], [], []>} : vector<128x256xbf16>, vector<256x256xbf16>, vector<128x256xf32> -> vector<128x256xf32>
    %c0_15 = arith.constant 0 : index
    %c768 = arith.constant 768 : index
    %24 = vector.load %arg4[%c0_15, %c768] : memref<1x1026xf32, #tpu.memory_space<vmem>>, vector<1x256xf32>
    %25 = vector.broadcast %24 : vector<1x256xf32> to vector<128x256xf32>
    %26 = arith.addf %23, %25 : vector<128x256xf32>
    %cst_16 = arith.constant 0.000000e+00 : f32
    %27 = vector.broadcast %cst_16 : f32 to vector<128x256xf32>
    %28 = arith.maximumf %26, %27 : vector<128x256xf32>
    %29 = tpu.concatenate %20, %28 in 1 : vector<128x256xf32>, vector<128x256xf32> -> vector<128x512xf32>
    %30 = arith.truncf %29 : vector<128x512xf32> to vector<128x512xbf16>
    %c0_17 = arith.constant 0 : index
    %c0_18 = arith.constant 0 : index
    %31 = vector.load %arg3[%c0_17, %c0_18] : memref<512x2xbf16, #tpu.memory_space<vmem>>, vector<512x2xbf16>
    %cst_19 = arith.constant dense<0.000000e+00> : vector<128x2xf32>
    %32 = tpu.matmul %30, %31, %cst_19 {dimension_numbers = #tpu.dot_dimension_numbers<[1], [0], [0], [1], [0, 0, 1, 1], [], []>} : vector<128x512xbf16>, vector<512x2xbf16>, vector<128x2xf32> -> vector<128x2xf32>
    %c0_20 = arith.constant 0 : index
    %c1024 = arith.constant 1024 : index
    %33 = vector.load %arg4[%c0_20, %c1024] : memref<1x1026xf32, #tpu.memory_space<vmem>>, vector<1x2xf32>
    %34 = vector.broadcast %33 : vector<1x2xf32> to vector<128x2xf32>
    %35 = arith.addf %32, %34 : vector<128x2xf32>
    %c0_21 = arith.constant 0 : index
    %c0_22 = arith.constant 0 : index
    %36 = vector.load %arg5[%c0_21, %c0_22] : memref<128x2xf32, #tpu.memory_space<vmem>>, vector<128x2xf32>
    tpu.vector_store %arg5[%c0_21, %c0_22], %35 {strides = array<i32>} : memref<128x2xf32, #tpu.memory_space<vmem>>, vector<128x2xf32>,
    return
  }
}

</mosaic_0001>

<bundles_post_ra>
// kernel: double_value_net.1
= control target key start
LH: loop header
LB: loop body
LE: loop exit
PB: predicated region body
PF: predicated region fallthrough
CT: control target
= control target key end

     0   :  { %10 = vsyncpa [#allocation3], 0  ;;  %s2337_s21 = smov [#allocation2]   ;;  %s2338_s23 = smov 128   ;;  %s2947_s0 = inlined_call_operand.vmem [shape: f32[128,16], index: 0, kind: input, shape index: {}]   ;;  %s2948_s1 = inlined_call_operand.vmem [shape: bf16[16,512], index: 1, kind: input, shape index: {}]   ;;  %s2949_s2 = inlined_call_operand.hbm [shape: bf16[2,256,256], index: 2, kind: input, shape index: {}]   ;;  %s2950_s3 = inlined_call_operand.vmem [shape: bf16[512,2], index: 3, kind: input, shape index: {}]   ;;  %s2951_s4 = inlined_call_operand.vmem [shape: f32[1,1026], index: 4, kind: input, shape index: {}]   ;;  %s2952_s5 = inlined_call_operand.vmem [shape: f32[128,2], index: 5, kind: output, shape index: {}]  }
   0x1   :  { %s19_s20 = sshll.u32 %s2949_s2, 4  ;;  %s21_s22 = sshll.u32 %s2337_s21, 4  ;;  %s20_s20 = int_to_ptr.hbm [resolvable:$true] %s19_s20  ;;  %s22_s22 = int_to_ptr.vmem [resolvable:$true] %s21_s22 }
   0x2   :  { %s2339_s24 = smov 8  }
   0x3   :  { %27 = dma.hbm_to_vmem [thread:$0]  %s20_s20, 8192, %s22_s22, [#allocation3], %s2338_s23, %s2338_s23, %s2339_s24  }
   0x4   :  { %2335 = dma.done.wait [#allocation3], 8192  }
   0x5   :  { %2336 = vsyncadd [#allocation3], 4294959104  ;;  %v1777_v0 = vld [vmem:[%s2948_s1] sm:$0xf]  ;;  %v2209_v1 = vld [vmem:[%s2948_s1 + $0xc] sm:$0xf0] }
   0x6   :  { %v2207_v2 = vld [vmem:[%s2948_s1 + $0x4] sm:$0xf]  ;;  %v1778_v3 = vor.u32 %v2209_v1, %v1777_v0  ;;  %v1779_v4 = vld [vmem:[%s2948_s1 + $0x10] sm:$0xf0]  ;;  %v38_v6 = vld [vmem:[%s2947_s0 + $0x8] sm:$0xff]  ;;  %vm95_vm0 = vcmask 130048  }
   0x7   :  { %v37_v5 = vld [vmem:[%s2947_s0] sm:$0xff]  ;;  %v1782_v7 = vor.u32 %v2207_v2, %v1779_v4  ;;  %v1785_v9 = vld [vmem:[%s2948_s1 + $0x8] sm:$0xf]  ;;  %v2210_v10 = vld [vmem:[%s2948_s1 + $0x14] sm:$0xf0]  ;;  %vm1753_vm1 = vcmask 15360  }
   0x8   :  { %v53_v8 = vpack.c.bf16 %v38_v6, %v37_v5  ;;  %v2208_v11 = vld [vmem:[%s2948_s1 + $0xc] sm:$0xf]  ;;  %127 = vmatpush.bf16.msra.mxu0 %v1778_v3  ;;  %v1786_v12 = vor.u32 %v2210_v10, %v1785_v9  ;;  %v1787_v13 = vld [vmem:[%s2948_s1 + $0x18] sm:$0xf0]  ;;  %v2225_v14 = vld [vmem:[#allocation2 + $0x74] sm:$0xf] }
   0x9   :  { %v1883_v15 = vld [vmem:[#allocation2 + $0x78] sm:$0xf0]  ;;  %176 = vmatpush.bf16.msra.mxu1 %v1782_v7  ;;  %v1790_v16 = vor.u32 %v2208_v11, %v1787_v13  ;;  %v2241_v18 = vld [vmem:[#allocation2 + $0xf4] sm:$0xf]  ;;  %v1881_v21 = vld [vmem:[#allocation2 + $0x70] sm:$0xf] }
   0xa   :  { %v1886_v17 = vor.u32 %v2225_v14, %v1883_v15  ;;  %v1947_v19 = vld [vmem:[#allocation2 + $0xf8] sm:$0xf0]  ;;  %225 = vmatpush.bf16.msra.mxu2 %v1786_v12  ;;  %v2226_v22 = vld [vmem:[#allocation2 + $0x74] sm:$0xf0]  ;;  %v1945_v24 = vld [vmem:[#allocation2 + $0xf0] sm:$0xf] }
   0xb   :  { %v1950_v20 = vor.u32 %v2241_v18, %v1947_v19  ;;  %1791 = vmatmul.msk.bf16.vlgmr.msra.gmra.mxu0 %vm95_vm0, %v53_v8  ;;  %274 = vmatpush.bf16.msra.mxu3 %v1790_v16  ;;  %v1882_v23 = vor.u32 %v2226_v22, %v1881_v21  ;;  %v2242_v25 = vld [vmem:[#allocation2 + $0xf4] sm:$0xf0]  ;;  %v2223_v26 = vld [vmem:[#allocation2 + $0x64] sm:$0xf]  ;;  %v1875_v28 = vld [vmem:[#allocation2 + $0x68] sm:$0xf0] }
   0xc   :  { %1799 = vmatmul.msk.bf16.vlgmr.msra.gmra.mxu1 %vm95_vm0, %v53_v8  ;;  %v1946_v27 = vor.u32 %v2242_v25, %v1945_v24  ;;  %v2239_v29 = vld [vmem:[#allocation2 + $0xe4] sm:$0xf]  ;;  %v1939_v30 = vld [vmem:[#allocation2 + $0xe8] sm:$0xf0]  ;;  %v1878_v31 = vor.u32 %v2223_v26, %v1875_v28  ;;  %v1873_v33 = vld [vmem:[#allocation2 + $0x60] sm:$0xf] }
   0xd   :  { %1807 = vmatmul.msk.bf16.vlgmr.msra.gmra.mxu2 %vm95_vm0, %v53_v8  ;;  %v1942_v32 = vor.u32 %v2239_v29, %v1939_v30  ;;  %610 = vmatpush.bf16.msrb.mxu0 %v1882_v23  ;;  %v2224_v34 = vld [vmem:[#allocation2 + $0x64] sm:$0xf0]  ;;  %v1937_v35 = vld [vmem:[#allocation2 + $0xe0] sm:$0xf]  ;;  %v2221_v39 = vld [vmem:[#allocation2 + $0x54] sm:$0xf] }
   0xe   :  { %708 = vmatpush.bf16.msrb.mxu2 %v1886_v17  ;;  %1815 = vmatmul.msk.bf16.vlgmr.msra.gmra.mxu3 %vm95_vm0, %v53_v8  ;;  %v2240_v36 = vld [vmem:[#allocation2 + $0xe4] sm:$0xf0]  ;;  %v1874_v37 = vor.u32 %v2224_v34, %v1873_v33  ;;  %v1867_v40 = vld [vmem:[#allocation2 + $0x58] sm:$0xf0]  ;;  %v2237_v41 = vld [vmem:[#allocation2 + $0xd4] sm:$0xf] }
   0xf   :  { %757 = vmatpush.bf16.msrb.mxu3 %v1950_v20  ;;  %659 = vmatpush.bf16.msrb.mxu1 %v1946_v27  ;;  %v1938_v38 = vor.u32 %v2240_v36, %v1937_v35  ;;  %v1870_v42 = vor.u32 %v2221_v39, %v1867_v40  ;;  %v1931_v43 = vld [vmem:[#allocation2 + $0xd8] sm:$0xf0]  ;;  %v39_v45 = vld [vmem:[%s2947_s0 + $0x10] sm:$0xff]  ;;  %v2222_v49 = vld [vmem:[#allocation2 + $0x54] sm:$0xf0] }
  0x10   :  { %v1934_v44 = vor.u32 %v2237_v41, %v1931_v43  ;;  %v40_v46 = vld [vmem:[%s2947_s0 + $0x18] sm:$0xff]  ;;  %v1865_v48 = vld [vmem:[#allocation2 + $0x50] sm:$0xf]  ;;  %v2219_v54 = vld [vmem:[#allocation2 + $0x44] sm:$0xf] }
  0x11   :  { %611 = vmatpush.bf16.msrb.mxu0 %v1874_v37  ;;  %v54_v47 = vpack.c.bf16 %v40_v46, %v39_v45  ;;  %v1929_v50 = vld [vmem:[#allocation2 + $0xd0] sm:$0xf]  ;;  %v1866_v51 = vor.u32 %v2222_v49, %v1865_v48  ;;  %v2238_v52 = vld [vmem:[#allocation2 + $0xd4] sm:$0xf0]  ;;  %v1859_v55 = vld [vmem:[#allocation2 + $0x48] sm:$0xf0] }
  0x12   :  { %709 = vmatpush.bf16.msrb.mxu2 %v1878_v31  ;;  %v1930_v53 = vor.u32 %v2238_v52, %v1929_v50  ;;  %v2235_v56 = vld [vmem:[#allocation2 + $0xc4] sm:$0xf]  ;;  %v1862_v57 = vor.u32 %v2219_v54, %v1859_v55  ;;  %v1923_v58 = vld [vmem:[#allocation2 + $0xc8] sm:$0xf0]  ;;  %v1857_v63 = vld [vmem:[#allocation2 + $0x40] sm:$0xf] }
  0x13   :  { %758 = vmatpush.bf16.msrb.mxu3 %v1942_v32  ;;  %660 = vmatpush.bf16.msrb.mxu1 %v1938_v38  ;;  %v1926_v59 = vor.u32 %v2235_v56, %v1923_v58  ;;  %v41_v60 = vld [vmem:[%s2947_s0 + $0x20] sm:$0xff]  ;;  %v42_v61 = vld [vmem:[%s2947_s0 + $0x28] sm:$0xff]  ;;  %v2217_v5 = vld [vmem:[#allocation2 + $0x34] sm:$0xf] }
  0x14   :  { %v55_v62 = vpack.c.bf16 %v42_v61, %v41_v60  ;;  %v2220_v0 = vld [vmem:[#allocation2 + $0x44] sm:$0xf0]  ;;  %v1921_v1 = vld [vmem:[#allocation2 + $0xc0] sm:$0xf]  ;;  %v1851_v6 = vld [vmem:[#allocation2 + $0x38] sm:$0xf0] }
  0x15   :  { %612 = vmatpush.bf16.msrb.mxu0 %v1866_v51  ;;  %v1858_v2 = vor.u32 %v2220_v0, %v1857_v63  ;;  %v2236_v3 = vld [vmem:[#allocation2 + $0xc4] sm:$0xf0]  ;;  %v2233_v7 = vld [vmem:[#allocation2 + $0xb4] sm:$0xf]  ;;  %v1854_v8 = vor.u32 %v2217_v5, %v1851_v6  ;;  %v1915_v9 = vld [vmem:[#allocation2 + $0xb8] sm:$0xf0] }
  0x16   :  { %710 = vmatpush.bf16.msrb.mxu2 %v1870_v42  ;;  %v1922_v4 = vor.u32 %v2236_v3, %v1921_v1  ;;  %v1918_v10 = vor.u32 %v2233_v7, %v1915_v9  ;;  %v43_v11 = vld [vmem:[%s2947_s0 + $0x30] sm:$0xff]  ;;  %v44_v12 = vld [vmem:[%s2947_s0 + $0x38] sm:$0xff]  ;;  %v2215_v20 = vld [vmem:[#allocation2 + $0x24] sm:$0xf] }
  0x17   :  { %759 = vmatpush.bf16.msrb.mxu3 %v1934_v44  ;;  %661 = vmatpush.bf16.msrb.mxu1 %v1930_v53  ;;  %v56_v13 = vpack.c.bf16 %v44_v12, %v43_v11  ;;  %v1849_v14 = vld [vmem:[#allocation2 + $0x30] sm:$0xf]  ;;  %v2218_v15 = vld [vmem:[#allocation2 + $0x34] sm:$0xf0]  ;;  %v1843_v21 = vld [vmem:[#allocation2 + $0x28] sm:$0xf0] }
  0x18   :  { %v1913_v16 = vld [vmem:[#allocation2 + $0xb0] sm:$0xf]  ;;  %v1850_v17 = vor.u32 %v2218_v15, %v1849_v14  ;;  %v2234_v18 = vld [vmem:[#allocation2 + $0xb4] sm:$0xf0]  ;;  %v2231_v22 = vld [vmem:[#allocation2 + $0xa4] sm:$0xf]  ;;  %v1846_v23 = vor.u32 %v2215_v20, %v1843_v21 }
  0x19   :  { %613 = vmatpush.bf16.msrb.mxu0 %v1858_v2  ;;  %v1914_v19 = vor.u32 %v2234_v18, %v1913_v16  ;;  %v1907_v24 = vld [vmem:[#allocation2 + $0xa8] sm:$0xf0]  ;;  %v45_v26 = vld [vmem:[%s2947_s0 + $0x40] sm:$0xff]  ;;  %v2216_v30 = vld [vmem:[#allocation2 + $0x24] sm:$0xf0] }
  0x1a   :  { %711 = vmatpush.bf16.msrb.mxu2 %v1862_v57  ;;  %v1910_v25 = vor.u32 %v2231_v22, %v1907_v24  ;;  %v46_v27 = vld [vmem:[%s2947_s0 + $0x48] sm:$0xff]  ;;  %v1841_v29 = vld [vmem:[#allocation2 + $0x20] sm:$0xf]  ;;  %v2213_v35 = vld [vmem:[#allocation2 + $0x14] sm:$0xf] }
  0x1b   :  { %1792 = vmatmul.msk.bf16.gmra.mxu0 %vm95_vm0, %v54_v47  ;;  %760 = vmatpush.bf16.msrb.mxu3 %v1926_v59  ;;  %v57_v28 = vpack.c.bf16 %v46_v27, %v45_v26  ;;  %v1905_v31 = vld [vmem:[#allocation2 + $0xa0] sm:$0xf]  ;;  %v1842_v32 = vor.u32 %v2216_v30, %v1841_v29  ;;  %v2232_v33 = vld [vmem:[#allocation2 + $0xa4] sm:$0xf0]  ;;  %v1835_v36 = vld [vmem:[#allocation2 + $0x18] sm:$0xf0] }
  0x1c   :  { %1800 = vmatmul.msk.bf16.gmra.mxu1 %vm95_vm0, %v54_v47  ;;  %v1906_v34 = vor.u32 %v2232_v33, %v1905_v31  ;;  %v2229_v37 = vld [vmem:[#allocation2 + $0x94] sm:$0xf]  ;;  %v1838_v38 = vor.u32 %v2213_v35, %v1835_v36  ;;  %v1899_v39 = vld [vmem:[#allocation2 + $0x98] sm:$0xf0]  ;;  %v1833_v44 = vld [vmem:[#allocation2 + $0x10] sm:$0xf] }
  0x1d   :  { %1808 = vmatmul.msk.bf16.gmra.mxu2 %vm95_vm0, %v54_v47  ;;  %662 = vmatpush.bf16.msrb.mxu1 %v1922_v4  ;;  %v1902_v40 = vor.u32 %v2229_v37, %v1899_v39  ;;  %v47_v41 = vld [vmem:[%s2947_s0 + $0x50] sm:$0xff]  ;;  %v48_v42 = vld [vmem:[%s2947_s0 + $0x58] sm:$0xff]  ;;  %v2211_v50 = vld [vmem:[#allocation2 + $0x4] sm:$0xf] }
  0x1e   :  { %1816 = vmatmul.msk.bf16.gmra.mxu3 %vm95_vm0, %v54_v47  ;;  %712 = vmatpush.bf16.msrb.mxu2 %v1854_v8  ;;  %v58_v43 = vpack.c.bf16 %v48_v42, %v47_v41  ;;  %v2214_v45 = vld [vmem:[#allocation2 + $0x14] sm:$0xf0]  ;;  %v1897_v46 = vld [vmem:[#allocation2 + $0x90] sm:$0xf]  ;;  %v1827_v51 = vld [vmem:[#allocation2 + $0x8] sm:$0xf0] }
  0x1f   :  { %761 = vmatpush.bf16.msrb.mxu3 %v1918_v10  ;;  %614 = vmatpush.bf16.msrb.mxu0 %v1850_v17  ;;  %v1834_v47 = vor.u32 %v2214_v45, %v1833_v44  ;;  %v2230_v48 = vld [vmem:[#allocation2 + $0x94] sm:$0xf0]  ;;  %v1830_v52 = vor.u32 %v2211_v50, %v1827_v51  ;;  %v49_v53 = vld [vmem:[%s2947_s0 + $0x60] sm:$0xff]  ;;  %v50_v54 = vld [vmem:[%s2947_s0 + $0x68] sm:$0xff] }
  0x20   :  { %v1898_v49 = vor.u32 %v2230_v48, %v1897_v46  ;;  %v59_v55 = vpack.c.bf16 %v50_v54, %v49_v53  ;;  %v2227_v56 = vld [vmem:[#allocation2 + $0x84] sm:$0xf]  ;;  %v1891_v57 = vld [vmem:[#allocation2 + $0x88] sm:$0xf0]  ;;  %v1825_v58 = vld [vmem:[#allocation2] sm:$0xf] }
  0x21   :  { %663 = vmatpush.bf16.msrb.mxu1 %v1914_v19  ;;  %v1894_v59 = vor.u32 %v2227_v56, %v1891_v57  ;;  %v2212_v60 = vld [vmem:[#allocation2 + $0x4] sm:$0xf0]  ;;  %v1889_v61 = vld [vmem:[#allocation2 + $0x80] sm:$0xf]  ;;  %v51_v1 = vld [vmem:[%s2947_s0 + $0x70] sm:$0xff] }
  0x22   :  { %713 = vmatpush.bf16.msrb.mxu2 %v1846_v23  ;;  %v1826_v63 = vor.u32 %v2212_v60, %v1825_v58  ;;  %v52_v2 = vld [vmem:[%s2947_s0 + $0x78] sm:$0xff]  ;;  %v2257_v4 = vld [vmem:[#allocation2 + $0x174] sm:$0xf]  ;;  %v2009_v10 = vld [vmem:[#allocation2 + $0x170] sm:$0xf] }
  0x23   :  { %762 = vmatpush.bf16.msrb.mxu3 %v1910_v25  ;;  %615 = vmatpush.bf16.msrb.mxu0 %v1842_v32  ;;  %v60_v3 = vpack.c.bf16 %v52_v2, %v51_v1  ;;  %v2011_v5 = vld [vmem:[#allocation2 + $0x178] sm:$0xf0]  ;;  %v2273_v7 = vld [vmem:[#allocation2 + $0x1f4] sm:$0xf]  ;;  %v2258_v11 = vld [vmem:[#allocation2 + $0x174] sm:$0xf0] }
  0x24   :  { %v2014_v6 = vor.u32 %v2257_v4, %v2011_v5  ;;  %v2075_v8 = vld [vmem:[#allocation2 + $0x1f8] sm:$0xf0]  ;;  %v2010_v12 = vor.u32 %v2258_v11, %v2009_v10  ;;  %v2274_v14 = vld [vmem:[#allocation2 + $0x1f4] sm:$0xf0]  ;;  %v65_v16 = vld [vmem:[%s2951_s4] sm:$0xf] }
  0x25   :  { %664 = vmatpush.bf16.msrb.mxu1 %v1906_v34  ;;  %v2078_v9 = vor.u32 %v2273_v7, %v2075_v8  ;;  %v2255_v18 = vld [vmem:[#allocation2 + $0x164] sm:$0xf]  ;;  %v2003_v19 = vld [vmem:[#allocation2 + $0x168] sm:$0xf0]  ;;  %v2480_v22 = vperm.slane %v65_v16, 0  ;;  %v2482_v23 = vperm.slane %v65_v16, 1 }
  0x26   :  { %714 = vmatpush.bf16.msrb.mxu2 %v1838_v38  ;;  %v2006_v21 = vor.u32 %v2255_v18, %v2003_v19  ;;  %v2271_v24 = vld [vmem:[#allocation2 + $0x1e4] sm:$0xf]  ;;  %v2067_v25 = vld [vmem:[#allocation2 + $0x1e8] sm:$0xf0]  ;;  %v2001_v27 = vld [vmem:[#allocation2 + $0x160] sm:$0xf] }
  0x27   :  { %763 = vmatpush.bf16.msrb.mxu3 %v1902_v40  ;;  %616 = vmatpush.bf16.msrb.mxu0 %v1834_v47  ;;  %v2070_v26 = vor.u32 %v2271_v24, %v2067_v25  ;;  %v2065_v29 = vld [vmem:[#allocation2 + $0x1e0] sm:$0xf]  ;;  %v2272_v31 = vld [vmem:[#allocation2 + $0x1e4] sm:$0xf0]  ;;  %v2487_v39 = vperm.slane %v65_v16, 2  ;;  %v2490_v42 = vperm.slane %v65_v16, 3 }
  0x28   :  { %v2066_v33 = vor.u32 %v2272_v31, %v2065_v29  ;;  %v2253_v53 = vld [vmem:[#allocation2 + $0x154] sm:$0xf]  ;;  %v1995_v54 = vld [vmem:[#allocation2 + $0x158] sm:$0xf0]  ;;  %v1993_v4 = vld [vmem:[#allocation2 + $0x150] sm:$0xf] }
  0x29   :  { %665 = vmatpush.bf16.msrb.mxu1 %v1898_v49  ;;  %v2059_v1 = vld [vmem:[#allocation2 + $0x1d8] sm:$0xf0]  ;;  %v2254_v5 = vld [vmem:[#allocation2 + $0x154] sm:$0xf0]  ;;  %v2251_v31 = vld [vmem:[#allocation2 + $0x144] sm:$0xf] }
  0x2a   :  { %715 = vmatpush.bf16.msrb.mxu2 %v1830_v52  ;;  %v1994_v8 = vor.u32 %v2254_v5, %v1993_v4 }
  0x2b   :  { %1793 = vmatmul.msk.bf16.gmra.mxu0 %vm95_vm0, %v55_v62  ;;  %764 = vmatpush.bf16.msrb.mxu3 %v1894_v59  ;;  %v1998_v59 = vor.u32 %v2253_v53, %v1995_v54 }
  0x2c   :  { %1801 = vmatmul.msk.bf16.gmra.mxu1 %vm95_vm0, %v55_v62  ;;  %617 = vmatpush.bf16.msrb.mxu0 %v1826_v63 }
  0x2d   :  { %1809 = vmatmul.msk.bf16.gmra.mxu2 %vm95_vm0, %v55_v62 }
  0x2e   :  { %1817 = vmatmul.msk.bf16.gmra.mxu3 %vm95_vm0, %v55_v62  ;;  %v2228_v62 = vld [vmem:[#allocation2 + $0x84] sm:$0xf0]  ;;  %1135 = vmatpush.bf16.msra.mxu2 %v2014_v6  ;;  %v2057_v6 = vld [vmem:[#allocation2 + $0x1d0] sm:$0xf] }
  0x2f   :  { %v1890_v0 = vor.u32 %v2228_v62, %v1889_v61  ;;  %1184 = vmatpush.bf16.msra.mxu3 %v2078_v9  ;;  %v2270_v9 = vld [vmem:[#allocation2 + $0x1d4] sm:$0xf0] }
  0x30   :  { %1037 = vmatpush.bf16.msra.mxu0 %v2010_v12  ;;  %v2058_v11 = vor.u32 %v2270_v9, %v2057_v6 }
  0x31   :  { %666 = vmatpush.bf16.msrb.mxu1 %v1890_v0  ;;  %v2269_v0 = vld [vmem:[#allocation2 + $0x1d4] sm:$0xf] }
  0x32   :  { %1136 = vmatpush.bf16.msra.mxu2 %v2006_v21 }
  0x33   :  { %1185 = vmatpush.bf16.msra.mxu3 %v2070_v26 }
  0x36   :  { %1137 = vmatpush.bf16.msra.mxu2 %v1998_v59 }
  0x3b   :  { %1794 = vmatmul.msk.bf16.gmra.mxu0 %vm95_vm0, %v56_v13 }
  0x3c   :  { %1802 = vmatmul.msk.bf16.gmra.mxu1 %vm95_vm0, %v56_v13 }
  0x3d   :  { %1810 = vmatmul.msk.bf16.gmra.mxu2 %vm95_vm0, %v56_v13 }
  0x3e   :  { %1818 = vmatmul.msk.bf16.gmra.mxu3 %vm95_vm0, %v56_v13  ;;  %v2073_v13 = vld [vmem:[#allocation2 + $0x1f0] sm:$0xf] }
  0x3f   :  { %v2074_v15 = vor.u32 %v2274_v14, %v2073_v13 }
  0x41   :  { %1086 = vmatpush.bf16.msra.mxu1 %v2074_v15 }
  0x45   :  { %1087 = vmatpush.bf16.msra.mxu1 %v2066_v33 }
  0x49   :  { %1088 = vmatpush.bf16.msra.mxu1 %v2058_v11  ;;  %v2249_v11 = vld [vmem:[#allocation2 + $0x134] sm:$0xf] }
  0x4b   :  { %1795 = vmatmul.msk.bf16.gmra.mxu0 %vm95_vm0, %v57_v28 }
  0x4c   :  { %1803 = vmatmul.msk.bf16.gmra.mxu1 %vm95_vm0, %v57_v28 }
  0x4d   :  { %1811 = vmatmul.msk.bf16.gmra.mxu2 %vm95_vm0, %v57_v28 }
  0x4e   :  { %1819 = vmatmul.msk.bf16.gmra.mxu3 %vm95_vm0, %v57_v28  ;;  %v2256_v28 = vld [vmem:[#allocation2 + $0x164] sm:$0xf0] }
  0x4f   :  { %v2002_v30 = vor.u32 %v2256_v28, %v2001_v27 }
  0x51   :  { %1038 = vmatpush.bf16.msra.mxu0 %v2002_v30 }
  0x55   :  { %1039 = vmatpush.bf16.msra.mxu0 %v1994_v8 }
  0x5b   :  { %1796 = vmatmul.msk.bf16.gmra.mxu0 %vm95_vm0, %v58_v43 }
  0x5c   :  { %1804 = vmatmul.msk.bf16.gmra.mxu1 %vm95_vm0, %v58_v43 }
  0x5d   :  { %1812 = vmatmul.msk.bf16.gmra.mxu2 %vm95_vm0, %v58_v43 }
  0x5e   :  { %1820 = vmatmul.msk.bf16.gmra.mxu3 %vm95_vm0, %v58_v43 }
  0x6b   :  { %1797 = vmatmul.msk.bf16.gmra.mxu0 %vm95_vm0, %v59_v55 }
  0x6c   :  { %1805 = vmatmul.msk.bf16.gmra.mxu1 %vm95_vm0, %v59_v55 }
  0x6d   :  { %1813 = vmatmul.msk.bf16.gmra.mxu2 %vm95_vm0, %v59_v55 }
  0x6e   :  { %1821 = vmatmul.msk.bf16.gmra.mxu3 %vm95_vm0, %v59_v55 }
  0x7b   :  { %1798 = vmatmul.msk.bf16.gmra.mxu0 %vm95_vm0, %v60_v3 }
  0x7c   :  { %1806 = vmatmul.msk.bf16.gmra.mxu1 %vm95_vm0, %v60_v3 }
  0x7d   :  { %1814 = vmatmul.msk.bf16.gmra.mxu2 %vm95_vm0, %v60_v3 }
  0x7e   :  { %1822 = vmatmul.msk.bf16.gmra.mxu3 %vm95_vm0, %v60_v3  ;;  %v2062_v3 = vor.u32 %v2269_v0, %v2059_v1 }
  0x80   :  { %1186 = vmatpush.bf16.msra.mxu3 %v2062_v3 }
  0x88   :  { %v129_v17 = vpop.f32.mrf.mxu0 }
  0x89   :  { %v178_v20 = vpop.f32.mrf.mxu1  ;;  %v130_v32 = vadd.f32 %v129_v17, %v2480_v22 }
  0x8a   :  { %v179_v34 = vadd.f32 %v178_v20, %v2482_v23 }
  0x8b   :  { %v316_v43 = vmax.f32 %v130_v32, 0.0  ;;  %v1987_v32 = vld [vmem:[#allocation2 + $0x148] sm:$0xf0] }
  0x8c   :  { %v317_v45 = vmax.f32 %v179_v34, 0.0 }
  0x90   :  { %v131_v35 = vpop.f32.mrf.mxu0  ;;  %v227_v36 = vpop.f32.mrf.mxu2 }
  0x91   :  { %v132_v37 = vadd.f32 %v131_v35, %v2480_v22  ;;  %v180_v38 = vpop.f32.mrf.mxu1  ;;  %v276_v40 = vpop.f32.mrf.mxu3  ;;  %v228_v47 = vadd.f32 %v227_v36, %v2487_v39 }
  0x92   :  { %v181_v41 = vadd.f32 %v180_v38, %v2482_v23  ;;  %v277_v49 = vadd.f32 %v276_v40, %v2490_v42 }
  0x93   :  { %v320_v44 = vmax.f32 %v132_v37, 0.0  ;;  %v318_v55 = vmax.f32 %v228_v47, 0.0  ;;  %v1990_v37 = vor.u32 %v2251_v31, %v1987_v32  ;;  %v1985_v47 = vld [vmem:[#allocation2 + $0x140] sm:$0xf]  ;;  %v2266_v32 = vld [vmem:[#allocation2 + $0x1b4] sm:$0xf0] }
  0x94   :  { %v321_v46 = vmax.f32 %v181_v41, 0.0  ;;  %v319_v60 = vmax.f32 %v277_v49, 0.0  ;;  %v2049_v49 = vld [vmem:[#allocation2 + $0x1c0] sm:$0xf] }
  0x95   :  { %v380_v48 = vpack.c.bf16 %v320_v44, %v316_v43  ;;  %1138 = vmatpush.bf16.msra.mxu2 %v1990_v37  ;;  %v2267_v44 = vld [vmem:[#allocation2 + $0x1c4] sm:$0xf] }
  0x96   :  { %v381_v50 = vpack.c.bf16 %v321_v46, %v317_v45  ;;  %v2051_v45 = vld [vmem:[#allocation2 + $0x1c8] sm:$0xf0] }
  0x97   :  { %618 = vmatmul.bf16.vlgmr.msrb.gmra.mxu0 %v380_v48  ;;  %716 = vmatmul.bf16.vlgmr.msrb.gmra.mxu2 %v380_v48  ;;  %v2054_v46 = vor.u32 %v2267_v44, %v2051_v45  ;;  %v2252_v48 = vld [vmem:[#allocation2 + $0x144] sm:$0xf0] }
  0x98   :  { %667 = vmatmul.bf16.vlgmr.msrb.gmra.mxu1 %v381_v50  ;;  %765 = vmatmul.bf16.vlgmr.msrb.gmra.mxu3 %v381_v50  ;;  %v134_v51 = vpop.f32.mrf.mxu0  ;;  %v229_v52 = vpop.f32.mrf.mxu2 }
  0x99   :  { %v183_v56 = vpop.f32.mrf.mxu1  ;;  %v230_v57 = vadd.f32 %v229_v52, %v2487_v39  ;;  %v278_v58 = vpop.f32.mrf.mxu3  ;;  %v135_v10 = vadd.f32 %v134_v51, %v2480_v22  ;;  %v1986_v51 = vor.u32 %v2252_v48, %v1985_v47  ;;  %v2268_v52 = vld [vmem:[#allocation2 + $0x1c4] sm:$0xf0]  ;;  %1187 = vmatpush.bf16.msra.mxu3 %v2054_v46 }
  0x9a   :  { %v279_v61 = vadd.f32 %v278_v58, %v2490_v42  ;;  %v184_v12 = vadd.f32 %v183_v56, %v2482_v23 }
  0x9b   :  { %v322_v62 = vmax.f32 %v230_v57, 0.0  ;;  %v324_v19 = vmax.f32 %v135_v10, 0.0  ;;  %1040 = vmatpush.bf16.msra.mxu0 %v1986_v51 }
  0x9c   :  { %v323_v63 = vmax.f32 %v279_v61, 0.0  ;;  %v325_v21 = vmax.f32 %v184_v12, 0.0  ;;  %v1979_v12 = vld [vmem:[#allocation2 + $0x138] sm:$0xf0] }
  0x9d   :  { %v2496_v2 = vpack.c.bf16 %v322_v62, %v318_v55  ;;  %v2050_v55 = vor.u32 %v2268_v52, %v2049_v49 }
  0x9e   :  { %v2498_v7 = vpack.c.bf16 %v323_v63, %v319_v60 }
  0x9f   :  { %1089 = vmatpush.bf16.msra.mxu1 %v2050_v55 }
  0xa0   :  { %v136_v13 = vpop.f32.mrf.mxu0  ;;  %v232_v14 = vpop.f32.mrf.mxu2 }
  0xa1   :  { %v137_v15 = vadd.f32 %v136_v13, %v2480_v22  ;;  %v185_v16 = vpop.f32.mrf.mxu1  ;;  %v281_v17 = vpop.f32.mrf.mxu3  ;;  %v233_v25 = vadd.f32 %v232_v14, %v2487_v39 }
  0xa2   :  { %v186_v18 = vadd.f32 %v185_v16, %v2482_v23  ;;  %v282_v27 = vadd.f32 %v281_v17, %v2490_v42  ;;  %v1982_v17 = vor.u32 %v2249_v11, %v1979_v12  ;;  %v2033_v11 = vld [vmem:[#allocation2 + $0x1a0] sm:$0xf] }
  0xa3   :  { %v328_v20 = vmax.f32 %v137_v15, 0.0  ;;  %v326_v33 = vmax.f32 %v233_v25, 0.0  ;;  %v2043_v25 = vld [vmem:[#allocation2 + $0x1b8] sm:$0xf0] }
  0xa4   :  { %v329_v24 = vmax.f32 %v186_v18, 0.0  ;;  %v327_v38 = vmax.f32 %v282_v27, 0.0  ;;  %1139 = vmatpush.bf16.msra.mxu2 %v1982_v17  ;;  %v1977_v27 = vld [vmem:[#allocation2 + $0x130] sm:$0xf] }
  0xa5   :  { %v382_v26 = vpack.c.bf16 %v328_v20, %v324_v19 }
  0xa6   :  { %v383_v28 = vpack.c.bf16 %v329_v24, %v325_v21  ;;  %v2265_v24 = vld [vmem:[#allocation2 + $0x1b4] sm:$0xf] }
  0xa7   :  { %623 = vmatmul.bf16.gmra.mxu0 %v382_v26  ;;  %721 = vmatmul.bf16.gmra.mxu2 %v382_v26  ;;  %v2046_v26 = vor.u32 %v2265_v24, %v2043_v25 }
  0xa8   :  { %672 = vmatmul.bf16.gmra.mxu1 %v383_v28  ;;  %770 = vmatmul.bf16.gmra.mxu3 %v383_v28  ;;  %v139_v29 = vpop.f32.mrf.mxu0  ;;  %v234_v30 = vpop.f32.mrf.mxu2  ;;  %v2250_v28 = vld [vmem:[#allocation2 + $0x134] sm:$0xf0] }
  0xa9   :  { %v188_v34 = vpop.f32.mrf.mxu1  ;;  %v235_v35 = vadd.f32 %v234_v30, %v2487_v39  ;;  %v283_v36 = vpop.f32.mrf.mxu3  ;;  %v140_v54 = vadd.f32 %v139_v29, %v2480_v22  ;;  %v2041_v29 = vld [vmem:[#allocation2 + $0x1b0] sm:$0xf]  ;;  %v1978_v31 = vor.u32 %v2250_v28, %v1977_v27  ;;  %1188 = vmatpush.bf16.msra.mxu3 %v2046_v26 }
  0xaa   :  { %v284_v40 = vadd.f32 %v283_v36, %v2490_v42  ;;  %v189_v56 = vadd.f32 %v188_v34, %v2482_v23 }
  0xab   :  { %v330_v41 = vmax.f32 %v235_v35, 0.0  ;;  %v332_v63 = vmax.f32 %v140_v54, 0.0  ;;  %v2042_v35 = vor.u32 %v2266_v32, %v2041_v29  ;;  %1041 = vmatpush.bf16.msra.mxu0 %v1978_v31 }
  0xac   :  { %v331_v43 = vmax.f32 %v284_v40, 0.0  ;;  %v333_v1 = vmax.f32 %v189_v56, 0.0 }
  0xad   :  { %v2508_v50 = vpack.c.bf16 %v330_v41, %v326_v33  ;;  %1090 = vmatpush.bf16.msra.mxu1 %v2042_v35 }
  0xae   :  { %v2510_v53 = vpack.c.bf16 %v331_v43, %v327_v38 }
  0xb0   :  { %v141_v57 = vpop.f32.mrf.mxu0  ;;  %v237_v58 = vpop.f32.mrf.mxu2 }
  0xb1   :  { %v142_v59 = vadd.f32 %v141_v57, %v2480_v22  ;;  %v190_v60 = vpop.f32.mrf.mxu1  ;;  %v286_v61 = vpop.f32.mrf.mxu3  ;;  %v238_v4 = vadd.f32 %v237_v58, %v2487_v39  ;;  %v2247_v57 = vld [vmem:[#allocation2 + $0x124] sm:$0xf]  ;;  %v1971_v58 = vld [vmem:[#allocation2 + $0x128] sm:$0xf0] }
  0xb2   :  { %v191_v62 = vadd.f32 %v190_v60, %v2482_v23  ;;  %v287_v6 = vadd.f32 %v286_v61, %v2490_v42 }
  0xb3   :  { %v336_v0 = vmax.f32 %v142_v59, 0.0  ;;  %v334_v13 = vmax.f32 %v238_v4, 0.0 }
  0xb4   :  { %v337_v3 = vmax.f32 %v191_v62, 0.0  ;;  %v335_v18 = vmax.f32 %v287_v6, 0.0  ;;  %v2035_v6 = vld [vmem:[#allocation2 + $0x1a8] sm:$0xf0] }
  0xb5   :  { %v384_v5 = vpack.c.bf16 %v336_v0, %v332_v63  ;;  %v1974_v63 = vor.u32 %v2247_v57, %v1971_v58  ;;  %v1961_v57 = vld [vmem:[#allocation2 + $0x110] sm:$0xf]  ;;  %v2246_v58 = vld [vmem:[#allocation2 + $0x114] sm:$0xf0] }
  0xb6   :  { %v385_v8 = vpack.c.bf16 %v337_v3, %v333_v1 }
  0xb7   :  { %628 = vmatmul.bf16.gmra.mxu0 %v384_v5  ;;  %726 = vmatmul.bf16.gmra.mxu2 %v384_v5  ;;  %v2263_v5 = vld [vmem:[#allocation2 + $0x1a4] sm:$0xf] }
  0xb8   :  { %677 = vmatmul.bf16.gmra.mxu1 %v385_v8  ;;  %775 = vmatmul.bf16.gmra.mxu3 %v385_v8  ;;  %v144_v9 = vpop.f32.mrf.mxu0  ;;  %v239_v10 = vpop.f32.mrf.mxu2  ;;  %v2038_v8 = vor.u32 %v2263_v5, %v2035_v6 }
  0xb9   :  { %v193_v14 = vpop.f32.mrf.mxu1  ;;  %v240_v15 = vadd.f32 %v239_v10, %v2487_v39  ;;  %v288_v16 = vpop.f32.mrf.mxu3  ;;  %v145_v34 = vadd.f32 %v144_v9, %v2480_v22  ;;  %1140 = vmatpush.bf16.msra.mxu2 %v1974_v63  ;;  %v1969_v9 = vld [vmem:[#allocation2 + $0x120] sm:$0xf]  ;;  %v2248_v10 = vld [vmem:[#allocation2 + $0x124] sm:$0xf0] }
  0xba   :  { %v289_v19 = vadd.f32 %v288_v16, %v2490_v42  ;;  %v194_v36 = vadd.f32 %v193_v14, %v2482_v23  ;;  %v2264_v14 = vld [vmem:[#allocation2 + $0x1a4] sm:$0xf0]  ;;  %1189 = vmatpush.bf16.msra.mxu3 %v2038_v8 }
  0xbb   :  { %v338_v20 = vmax.f32 %v240_v15, 0.0  ;;  %v340_v45 = vmax.f32 %v145_v34, 0.0  ;;  %v2034_v17 = vor.u32 %v2264_v14, %v2033_v11 }
  0xbc   :  { %v339_v21 = vmax.f32 %v289_v19, 0.0  ;;  %v341_v47 = vmax.f32 %v194_v36, 0.0 }
  0xbd   :  { %v2520_v30 = vpack.c.bf16 %v338_v20, %v334_v13  ;;  %v1970_v13 = vor.u32 %v2248_v10, %v1969_v9  ;;  %1091 = vmatpush.bf16.msra.mxu1 %v2034_v17 }
  0xbe   :  { %v2522_v33 = vpack.c.bf16 %v339_v21, %v335_v18 }
  0xbf   :  { %1042 = vmatpush.bf16.msra.mxu0 %v1970_v13 }
  0xc0   :  { %v146_v37 = vpop.f32.mrf.mxu0  ;;  %v242_v38 = vpop.f32.mrf.mxu2 }
  0xc1   :  { %v147_v40 = vadd.f32 %v146_v37, %v2480_v22  ;;  %v195_v41 = vpop.f32.mrf.mxu1  ;;  %v291_v43 = vpop.f32.mrf.mxu3  ;;  %v243_v49 = vadd.f32 %v242_v38, %v2487_v39 }
  0xc2   :  { %v196_v44 = vadd.f32 %v195_v41, %v2482_v23  ;;  %v292_v52 = vadd.f32 %v291_v43, %v2490_v42  ;;  %v1963_v41 = vld [vmem:[#allocation2 + $0x118] sm:$0xf0] }
  0xc3   :  { %v344_v46 = vmax.f32 %v147_v40, 0.0  ;;  %v342_v59 = vmax.f32 %v243_v49, 0.0  ;;  %v2245_v40 = vld [vmem:[#allocation2 + $0x114] sm:$0xf] }
  0xc4   :  { %v345_v48 = vmax.f32 %v196_v44, 0.0  ;;  %v343_v0 = vmax.f32 %v292_v52, 0.0 }
  0xc5   :  { %v386_v51 = vpack.c.bf16 %v344_v46, %v340_v45 }
  0xc6   :  { %v387_v54 = vpack.c.bf16 %v345_v48, %v341_v47  ;;  %v1966_v47 = vor.u32 %v2245_v40, %v1963_v41  ;;  %v1953_v41 = vld [vmem:[#allocation2 + $0x100] sm:$0xf] }
  0xc7   :  { %633 = vmatmul.bf16.gmra.mxu0 %v386_v51  ;;  %731 = vmatmul.bf16.gmra.mxu2 %v386_v51 }
  0xc8   :  { %682 = vmatmul.bf16.gmra.mxu1 %v387_v54  ;;  %780 = vmatmul.bf16.gmra.mxu3 %v387_v54  ;;  %v149_v55 = vpop.f32.mrf.mxu0  ;;  %v244_v56 = vpop.f32.mrf.mxu2  ;;  %v2261_v54 = vld [vmem:[#allocation2 + $0x194] sm:$0xf] }
  0xc9   :  { %v198_v60 = vpop.f32.mrf.mxu1  ;;  %v245_v61 = vadd.f32 %v244_v56, %v2487_v39  ;;  %v293_v62 = vpop.f32.mrf.mxu3  ;;  %v150_v16 = vadd.f32 %v149_v55, %v2480_v22  ;;  %1141 = vmatpush.bf16.msra.mxu2 %v1966_v47  ;;  %v2027_v55 = vld [vmem:[#allocation2 + $0x198] sm:$0xf0]  ;;  %v2260_v47 = vld [vmem:[#allocation2 + $0x184] sm:$0xf0] }
  0xca   :  { %v294_v1 = vadd.f32 %v293_v62, %v2490_v42  ;;  %v199_v18 = vadd.f32 %v198_v60, %v2482_v23  ;;  %v2030_v56 = vor.u32 %v2261_v54, %v2027_v55  ;;  %v2262_v62 = vld [vmem:[#allocation2 + $0x194] sm:$0xf0] }
  0xcb   :  { %v346_v3 = vmax.f32 %v245_v61, 0.0  ;;  %v348_v27 = vmax.f32 %v150_v16, 0.0  ;;  %v1962_v61 = vor.u32 %v2246_v58, %v1961_v57 }
  0xcc   :  { %v347_v4 = vmax.f32 %v294_v1, 0.0  ;;  %v349_v29 = vmax.f32 %v199_v18, 0.0  ;;  %1190 = vmatpush.bf16.msra.mxu3 %v2030_v56 }
  0xcd   :  { %v2532_v12 = vpack.c.bf16 %v346_v3, %v342_v59  ;;  %v2025_v59 = vld [vmem:[#allocation2 + $0x190] sm:$0xf]  ;;  %1043 = vmatpush.bf16.msra.mxu0 %v1962_v61 }
  0xce   :  { %v2534_v15 = vpack.c.bf16 %v347_v4, %v343_v0  ;;  %v2026_v1 = vor.u32 %v2262_v62, %v2025_v59 }
  0xd0   :  { %v151_v19 = vpop.f32.mrf.mxu0  ;;  %v247_v20 = vpop.f32.mrf.mxu2  ;;  %1092 = vmatpush.bf16.msra.mxu1 %v2026_v1 }
  0xd1   :  { %v152_v21 = vadd.f32 %v151_v19, %v2480_v22  ;;  %v200_v24 = vpop.f32.mrf.mxu1  ;;  %v296_v25 = vpop.f32.mrf.mxu3  ;;  %v248_v32 = vadd.f32 %v247_v20, %v2487_v39 }
  0xd2   :  { %v201_v26 = vadd.f32 %v200_v24, %v2482_v23  ;;  %v297_v35 = vadd.f32 %v296_v25, %v2490_v42  ;;  %v2243_v25 = vld [vmem:[#allocation2 + $0x104] sm:$0xf] }
  0xd3   :  { %v352_v28 = vmax.f32 %v152_v21, 0.0  ;;  %v350_v43 = vmax.f32 %v248_v32, 0.0 }
  0xd4   :  { %v353_v31 = vmax.f32 %v201_v26, 0.0  ;;  %v351_v48 = vmax.f32 %v297_v35, 0.0  ;;  %v1955_v26 = vld [vmem:[#allocation2 + $0x108] sm:$0xf0] }
  0xd5   :  { %v388_v34 = vpack.c.bf16 %v352_v28, %v348_v27  ;;  %v2259_v27 = vld [vmem:[#allocation2 + $0x184] sm:$0xf]  ;;  %v2019_v35 = vld [vmem:[#allocation2 + $0x188] sm:$0xf0] }
  0xd6   :  { %v389_v36 = vpack.c.bf16 %v353_v31, %v349_v29 }
  0xd7   :  { %638 = vmatmul.bf16.gmra.mxu0 %v388_v34  ;;  %736 = vmatmul.bf16.gmra.mxu2 %v388_v34  ;;  %v1958_v34 = vor.u32 %v2243_v25, %v1955_v26 }
  0xd8   :  { %687 = vmatmul.bf16.gmra.mxu1 %v389_v36  ;;  %785 = vmatmul.bf16.gmra.mxu3 %v389_v36  ;;  %v154_v37 = vpop.f32.mrf.mxu0  ;;  %v249_v38 = vpop.f32.mrf.mxu2 }
  0xd9   :  { %v203_v44 = vpop.f32.mrf.mxu1  ;;  %v250_v45 = vadd.f32 %v249_v38, %v2487_v39  ;;  %v298_v46 = vpop.f32.mrf.mxu3  ;;  %v155_v0 = vadd.f32 %v154_v37, %v2480_v22  ;;  %v2022_v38 = vor.u32 %v2259_v27, %v2019_v35  ;;  %1142 = vmatpush.bf16.msra.mxu2 %v1958_v34 }
  0xda   :  { %v299_v49 = vadd.f32 %v298_v46, %v2490_v42  ;;  %v204_v3 = vadd.f32 %v203_v44, %v2482_v23  ;;  %v2017_v46 = vld [vmem:[#allocation2 + $0x180] sm:$0xf] }
  0xdb   :  { %v354_v51 = vmax.f32 %v250_v45, 0.0  ;;  %v356_v11 = vmax.f32 %v155_v0, 0.0  ;;  %1191 = vmatpush.bf16.msra.mxu3 %v2022_v38 }
  0xdc   :  { %v355_v52 = vmax.f32 %v299_v49, 0.0  ;;  %v357_v14 = vmax.f32 %v204_v3, 0.0 }
  0xdd   :  { %v2544_v60 = vpack.c.bf16 %v354_v51, %v350_v43  ;;  %v2244_v43 = vld [vmem:[#allocation2 + $0x104] sm:$0xf0] }
  0xde   :  { %v2546_v63 = vpack.c.bf16 %v355_v52, %v351_v48  ;;  %v1954_v45 = vor.u32 %v2244_v43, %v1953_v41  ;;  %v2018_v48 = vor.u32 %v2260_v47, %v2017_v46 }
  0xe0   :  { %v156_v4 = vpop.f32.mrf.mxu0  ;;  %v252_v5 = vpop.f32.mrf.mxu2  ;;  %1044 = vmatpush.bf16.msra.mxu0 %v1954_v45  ;;  %1093 = vmatpush.bf16.msra.mxu1 %v2018_v48 }
  0xe1   :  { %v157_v6 = vadd.f32 %v156_v4, %v2480_v22  ;;  %v205_v8 = vpop.f32.mrf.mxu1  ;;  %v301_v9 = vpop.f32.mrf.mxu3  ;;  %v253_v17 = vadd.f32 %v252_v5, %v2487_v39 }
  0xe2   :  { %v206_v10 = vadd.f32 %v205_v8, %v2482_v23  ;;  %v302_v19 = vadd.f32 %v301_v9, %v2490_v42 }
  0xe3   :  { %v360_v13 = vmax.f32 %v157_v6, 0.0  ;;  %v358_v28 = vmax.f32 %v253_v17, 0.0 }
  0xe4   :  { %v361_v16 = vmax.f32 %v206_v10, 0.0  ;;  %v359_v36 = vmax.f32 %v302_v19, 0.0 }
  0xe5   :  { %v390_v18 = vpack.c.bf16 %v360_v13, %v356_v11 }
  0xe6   :  { %v391_v20 = vpack.c.bf16 %v361_v16, %v357_v14 }
  0xe7   :  { %643 = vmatmul.bf16.gmra.mxu0 %v390_v18  ;;  %741 = vmatmul.bf16.gmra.mxu2 %v390_v18 }
  0xe8   :  { %692 = vmatmul.bf16.gmra.mxu1 %v391_v20  ;;  %790 = vmatmul.bf16.gmra.mxu3 %v391_v20  ;;  %v159_v21 = vpop.f32.mrf.mxu0  ;;  %v254_v24 = vpop.f32.mrf.mxu2 }
  0xe9   :  { %v208_v29 = vpop.f32.mrf.mxu1  ;;  %v255_v31 = vadd.f32 %v254_v24, %v2487_v39  ;;  %v303_v32 = vpop.f32.mrf.mxu3  ;;  %v160_v52 = vadd.f32 %v159_v21, %v2480_v22 }
  0xea   :  { %v304_v37 = vadd.f32 %v303_v32, %v2490_v42  ;;  %v209_v54 = vadd.f32 %v208_v29, %v2482_v23 }
  0xeb   :  { %v362_v40 = vmax.f32 %v255_v31, 0.0  ;;  %v364_v62 = vmax.f32 %v160_v52, 0.0 }
  0xec   :  { %v363_v44 = vmax.f32 %v304_v37, 0.0  ;;  %v365_v1 = vmax.f32 %v209_v54, 0.0 }
  0xed   :  { %v2556_v49 = vpack.c.bf16 %v362_v40, %v358_v28 }
  0xee   :  { %v2558_v51 = vpack.c.bf16 %v363_v44, %v359_v36 }
  0xf0   :  { %v161_v55 = vpop.f32.mrf.mxu0  ;;  %v257_v56 = vpop.f32.mrf.mxu2 }
  0xf1   :  { %v162_v57 = vadd.f32 %v161_v55, %v2480_v22  ;;  %v210_v58 = vpop.f32.mrf.mxu1  ;;  %v306_v59 = vpop.f32.mrf.mxu3  ;;  %v258_v4 = vadd.f32 %v257_v56, %v2487_v39 }
  0xf2   :  { %v211_v61 = vadd.f32 %v210_v58, %v2482_v23  ;;  %v307_v6 = vadd.f32 %v306_v59, %v2490_v42  ;;  %v2306_v59 = vld [vmem:[%s2950_s3 + $0xf8] sm:$0xff] }
  0xf3   :  { %v368_v0 = vmax.f32 %v162_v57, 0.0  ;;  %v366_v11 = vmax.f32 %v258_v4, 0.0  ;;  %v444_v57 = vld [vmem:[%s2951_s4 + $0x4] sm:$0x3]  ;;  %1704 = vmatpush.bf16.msrb.mxu3 %v2306_v59 }
  0xf4   :  { %v369_v3 = vmax.f32 %v211_v61, 0.0  ;;  %v367_v17 = vmax.f32 %v307_v6, 0.0  ;;  %v2290_v61 = vld [vmem:[%s2950_s3 + $0x78] sm:$0xff]  ;;  %v2604_v4 = vperm.slane %v444_v57, 1 }
  0xf5   :  { %v392_v5 = vpack.c.bf16 %v368_v0, %v364_v62  ;;  %1606 = vmatpush.bf16.msrb.mxu1 %v2290_v61 }
  0xf6   :  { %v393_v8 = vpack.c.bf16 %v369_v3, %v365_v1 }
  0xf7   :  { %648 = vmatmul.bf16.gmra.mxu0 %v392_v5  ;;  %746 = vmatmul.bf16.gmra.mxu2 %v392_v5  ;;  %v2297_v5 = vld [vmem:[%s2950_s3 + $0xb0] sm:$0xff] }
  0xf8   :  { %697 = vmatmul.bf16.gmra.mxu1 %v393_v8  ;;  %795 = vmatmul.bf16.gmra.mxu3 %v393_v8  ;;  %v164_v9 = vpop.f32.mrf.mxu0  ;;  %v259_v10 = vpop.f32.mrf.mxu2 }
  0xf9   :  { %v213_v13 = vpop.f32.mrf.mxu1  ;;  %v260_v14 = vadd.f32 %v259_v10, %v2487_v39  ;;  %v308_v16 = vpop.f32.mrf.mxu3  ;;  %v165_v25 = vadd.f32 %v164_v9, %v2480_v22 }
  0xfa   :  { %v309_v18 = vadd.f32 %v308_v16, %v2490_v42  ;;  %v214_v26 = vadd.f32 %v213_v13, %v2482_v23  ;;  %v2281_v16 = vld [vmem:[%s2950_s3 + $0x30] sm:$0xff] }
  0xfb   :  { %v370_v19 = vmax.f32 %v260_v14, 0.0  ;;  %v372_v35 = vmax.f32 %v165_v25, 0.0 }
  0xfc   :  { %v371_v20 = vmax.f32 %v309_v18, 0.0  ;;  %v373_v37 = vmax.f32 %v214_v26, 0.0 }
  0xfd   :  { %v2568_v21 = vpack.c.bf16 %v370_v19, %v366_v11  ;;  %v2289_v19 = vld [vmem:[%s2950_s3 + $0x70] sm:$0xff] }
  0xfe   :  { %v2570_v24 = vpack.c.bf16 %v371_v20, %v367_v17  ;;  %1607 = vmatpush.bf16.msrb.mxu1 %v2289_v19  ;;  %v2287_v19 = vld [vmem:[%s2950_s3 + $0x60] sm:$0xff] }
 0x100   :  { %v166_v27 = vpop.f32.mrf.mxu0  ;;  %v262_v28 = vpop.f32.mrf.mxu2 }
 0x101   :  { %v167_v29 = vadd.f32 %v166_v27, %v2480_v22  ;;  %v215_v31 = vpop.f32.mrf.mxu1  ;;  %v311_v32 = vpop.f32.mrf.mxu3  ;;  %v263_v40 = vadd.f32 %v262_v28, %v2487_v39 }
 0x102   :  { %v216_v34 = vadd.f32 %v215_v31, %v2482_v23  ;;  %v312_v43 = vadd.f32 %v311_v32, %v2490_v42  ;;  %v2298_v23 = vld [vmem:[%s2950_s3 + $0xb8] sm:$0xff] }
 0x103   :  { %v376_v36 = vmax.f32 %v167_v29, 0.0  ;;  %v374_v22 = vmax.f32 %v263_v40, 0.0  ;;  %1655 = vmatpush.bf16.msrb.mxu2 %v2298_v23 }
 0x104   :  { %v377_v38 = vmax.f32 %v216_v34, 0.0  ;;  %v375_v48 = vmax.f32 %v312_v43, 0.0 }
 0x105   :  { %v394_v41 = vpack.c.bf16 %v376_v36, %v372_v35 }
 0x106   :  { %v395_v44 = vpack.c.bf16 %v377_v38, %v373_v37  ;;  %v2296_v38 = vld [vmem:[%s2950_s3 + $0xa8] sm:$0xff] }
 0x107   :  { %653 = vmatmul.bf16.gmra.mxu0 %v394_v41  ;;  %751 = vmatmul.bf16.gmra.mxu2 %v394_v41 }
 0x108   :  { %702 = vmatmul.bf16.gmra.mxu1 %v395_v44  ;;  %800 = vmatmul.bf16.gmra.mxu3 %v395_v44  ;;  %v264_v45 = vpop.f32.mrf.mxu2 }
 0x109   :  { %v265_v46 = vadd.f32 %v264_v45, %v2487_v39  ;;  %v313_v47 = vpop.f32.mrf.mxu3  ;;  %v2282_v39 = vld [vmem:[%s2950_s3 + $0x38] sm:$0xff]  ;;  %1656 = vmatpush.bf16.msrb.mxu2 %v2297_v5 }
 0x10a   :  { %v314_v52 = vadd.f32 %v313_v47, %v2490_v42  ;;  %v2596_v42 = vperm.slane %v444_v57, 0  ;;  %1557 = vmatpush.bf16.msrb.mxu0 %v2282_v39  ;;  %v2304_v47 = vld [vmem:[%s2950_s3 + $0xe8] sm:$0xff] }
 0x10b   :  { %v378_v54 = vmax.f32 %v265_v46, 0.0 }
 0x10c   :  { %v379_v55 = vmax.f32 %v314_v52, 0.0  ;;  %v2288_v52 = vld [vmem:[%s2950_s3 + $0x68] sm:$0xff] }
 0x10d   :  { %v2583_v56 = vpack.c.bf16 %v378_v54, %v374_v22  ;;  %1657 = vmatpush.bf16.msrb.mxu2 %v2296_v38  ;;  %1608 = vmatpush.bf16.msrb.mxu1 %v2288_v52  ;;  %v2286_v52 = vld [vmem:[%s2950_s3 + $0x58] sm:$0xff] }
 0x10e   :  { %v2588_v58 = vpack.c.bf16 %v379_v55, %v375_v48  ;;  %1558 = vmatpush.bf16.msrb.mxu0 %v2281_v16 }
 0x111   :  { %1609 = vmatpush.bf16.msrb.mxu1 %v2287_v19  ;;  %v2285_v19 = vld [vmem:[%s2950_s3 + $0x50] sm:$0xff] }
 0x114   :  { %v619_v62 = vpop.f32.mrf.mxu0 }
 0x115   :  { %v620_v0 = vadd.f32 %v619_v62, %v2596_v42  ;;  %v668_v1 = vpop.f32.mrf.mxu1  ;;  %1610 = vmatpush.bf16.msrb.mxu1 %v2286_v52 }
 0x117   :  { %v669_v3 = vadd.f32 %v668_v1, %v620_v0  ;;  %1045 = vmatmul.bf16.vlgmr.msra.gmra.mxu0 %v2496_v2  ;;  %1143 = vmatmul.bf16.vlgmr.msra.gmra.mxu2 %v2496_v2 }
 0x118   :  { %1094 = vmatmul.bf16.vlgmr.msra.gmra.mxu1 %v2498_v7  ;;  %1192 = vmatmul.bf16.vlgmr.msra.gmra.mxu3 %v2498_v7  ;;  %v2305_v7 = vld [vmem:[%s2950_s3 + $0xf0] sm:$0xff] }
 0x119   :  { %v806_v17 = vmax.f32 %v669_v3, 0.0  ;;  %1705 = vmatpush.bf16.msrb.mxu3 %v2305_v7  ;;  %v2303_v7 = vld [vmem:[%s2950_s3 + $0xe0] sm:$0xff]  ;;  %1611 = vmatpush.bf16.msrb.mxu1 %v2285_v19 }
 0x11a   :  { %v717_v6 = vpop.f32.mrf.mxu2 }
 0x11b   :  { %v718_v8 = vadd.f32 %v717_v6, %v2604_v4  ;;  %v766_v9 = vpop.f32.mrf.mxu3  ;;  %v2295_v6 = vld [vmem:[%s2950_s3 + $0xa0] sm:$0xff] }
 0x11c   :  { %v621_v10 = vpop.f32.mrf.mxu0  ;;  %1658 = vmatpush.bf16.msrb.mxu2 %v2295_v6 }
 0x11d   :  { %v767_v11 = vadd.f32 %v766_v9, %v718_v8  ;;  %v622_v13 = vadd.f32 %v621_v10, %v2596_v42  ;;  %v670_v2 = vpop.f32.mrf.mxu1  ;;  %1706 = vmatpush.bf16.msrb.mxu3 %v2304_v47  ;;  %v2302_v47 = vld [vmem:[%s2950_s3 + $0xd8] sm:$0xff] }
 0x11f   :  { %v671_v14 = vadd.f32 %v670_v2, %v622_v13  ;;  %v807_v34 = vmax.f32 %v767_v11, 0.0 }
 0x121   :  { %v808_v18 = vmax.f32 %v671_v14, 0.0  ;;  %1707 = vmatpush.bf16.msrb.mxu3 %v2303_v7  ;;  %v2301_v7 = vld [vmem:[%s2950_s3 + $0xd0] sm:$0xff] }
 0x122   :  { %v719_v20 = vpop.f32.mrf.mxu2 }
 0x123   :  { %v2622_v25 = vpack.c.bf16 %v808_v18, %v806_v17  ;;  %v720_v26 = vadd.f32 %v719_v20, %v2604_v4  ;;  %v768_v27 = vpop.f32.mrf.mxu3 }
 0x124   :  { %v624_v28 = vpop.f32.mrf.mxu0 }
 0x125   :  { %v769_v29 = vadd.f32 %v768_v27, %v720_v26  ;;  %v625_v31 = vadd.f32 %v624_v28, %v2596_v42  ;;  %v673_v32 = vpop.f32.mrf.mxu1  ;;  %1708 = vmatpush.bf16.msrb.mxu3 %v2302_v47 }
 0x127   :  { %v809_v35 = vmax.f32 %v769_v29, 0.0  ;;  %v674_v36 = vadd.f32 %v673_v32, %v625_v31  ;;  %1050 = vmatmul.bf16.gmra.mxu0 %v2508_v50  ;;  %1148 = vmatmul.bf16.gmra.mxu2 %v2508_v50 }
 0x128   :  { %1099 = vmatmul.bf16.gmra.mxu1 %v2510_v53  ;;  %1197 = vmatmul.bf16.gmra.mxu3 %v2510_v53  ;;  %v2280_v53 = vld [vmem:[%s2950_s3 + $0x28] sm:$0xff] }
 0x129   :  { %v2630_v37 = vpack.c.bf16 %v809_v35, %v807_v34  ;;  %v810_v23 = vmax.f32 %v674_v36, 0.0  ;;  %1559 = vmatpush.bf16.msrb.mxu0 %v2280_v53  ;;  %1709 = vmatpush.bf16.msrb.mxu3 %v2301_v7 }
 0x12a   :  { %v722_v40 = vpop.f32.mrf.mxu2 }
 0x12b   :  { %v723_v41 = vadd.f32 %v722_v40, %v2604_v4  ;;  %v771_v43 = vpop.f32.mrf.mxu3  ;;  %v2294_v40 = vld [vmem:[%s2950_s3 + $0x98] sm:$0xff] }
 0x12c   :  { %v626_v44 = vpop.f32.mrf.mxu0  ;;  %1659 = vmatpush.bf16.msrb.mxu2 %v2294_v40 }
 0x12d   :  { %v772_v45 = vadd.f32 %v771_v43, %v723_v41  ;;  %v627_v22 = vadd.f32 %v626_v44, %v2596_v42  ;;  %v675_v50 = vpop.f32.mrf.mxu1 }
 0x12f   :  { %v676_v46 = vadd.f32 %v675_v50, %v627_v22  ;;  %v811_v1 = vmax.f32 %v772_v45, 0.0 }
 0x131   :  { %v812_v48 = vmax.f32 %v676_v46, 0.0 }
 0x132   :  { %v724_v54 = vpop.f32.mrf.mxu2 }
 0x133   :  { %v725_v55 = vadd.f32 %v724_v54, %v2604_v4  ;;  %v773_v57 = vpop.f32.mrf.mxu3  ;;  %v2647_v39 = vpack.c.bf16 %v812_v48, %v810_v23 }
 0x134   :  { %v629_v59 = vpop.f32.mrf.mxu0 }
 0x135   :  { %v774_v61 = vadd.f32 %v773_v57, %v725_v55  ;;  %v630_v62 = vadd.f32 %v629_v59, %v2596_v42  ;;  %v678_v0 = vpop.f32.mrf.mxu1 }
 0x137   :  { %v813_v3 = vmax.f32 %v774_v61, 0.0  ;;  %v679_v5 = vadd.f32 %v678_v0, %v630_v62  ;;  %1055 = vmatmul.bf16.gmra.mxu0 %v2520_v30  ;;  %1153 = vmatmul.bf16.gmra.mxu2 %v2520_v30 }
 0x138   :  { %1104 = vmatmul.bf16.gmra.mxu1 %v2522_v33  ;;  %1202 = vmatmul.bf16.gmra.mxu3 %v2522_v33  ;;  %v2279_v33 = vld [vmem:[%s2950_s3 + $0x20] sm:$0xff] }
 0x139   :  { %v2657_v8 = vpack.c.bf16 %v813_v3, %v811_v1  ;;  %v814_v17 = vmax.f32 %v679_v5, 0.0  ;;  %1560 = vmatpush.bf16.msrb.mxu0 %v2279_v33 }
 0x13a   :  { %v727_v9 = vpop.f32.mrf.mxu2 }
 0x13b   :  { %v728_v10 = vadd.f32 %v727_v9, %v2604_v4  ;;  %v776_v11 = vpop.f32.mrf.mxu3  ;;  %v2293_v9 = vld [vmem:[%s2950_s3 + $0x90] sm:$0xff] }
 0x13c   :  { %v631_v13 = vpop.f32.mrf.mxu0  ;;  %1660 = vmatpush.bf16.msrb.mxu2 %v2293_v9 }
 0x13d   :  { %v777_v2 = vadd.f32 %v776_v11, %v728_v10  ;;  %v632_v14 = vadd.f32 %v631_v13, %v2596_v42  ;;  %v680_v30 = vpop.f32.mrf.mxu1 }
 0x13f   :  { %v681_v16 = vadd.f32 %v680_v30, %v632_v14  ;;  %v815_v35 = vmax.f32 %v777_v2, 0.0 }
 0x141   :  { %v816_v18 = vmax.f32 %v681_v16, 0.0 }
 0x142   :  { %v729_v20 = vpop.f32.mrf.mxu2 }
 0x143   :  { %v730_v26 = vadd.f32 %v729_v20, %v2604_v4  ;;  %v778_v27 = vpop.f32.mrf.mxu3  ;;  %v2671_v28 = vpack.c.bf16 %v816_v18, %v814_v17 }
 0x144   :  { %v634_v29 = vpop.f32.mrf.mxu0 }
 0x145   :  { %v779_v31 = vadd.f32 %v778_v27, %v730_v26  ;;  %v635_v32 = vadd.f32 %v634_v29, %v2596_v42  ;;  %v683_v34 = vpop.f32.mrf.mxu1 }
 0x147   :  { %v817_v36 = vmax.f32 %v779_v31, 0.0  ;;  %v684_v38 = vadd.f32 %v683_v34, %v635_v32  ;;  %1060 = vmatmul.bf16.gmra.mxu0 %v2532_v12  ;;  %1158 = vmatmul.bf16.gmra.mxu2 %v2532_v12 }
 0x148   :  { %1109 = vmatmul.bf16.gmra.mxu1 %v2534_v15  ;;  %1207 = vmatmul.bf16.gmra.mxu3 %v2534_v15  ;;  %v2278_v15 = vld [vmem:[%s2950_s3 + $0x18] sm:$0xff] }
 0x149   :  { %v2681_v41 = vpack.c.bf16 %v817_v36, %v815_v35  ;;  %v818_v23 = vmax.f32 %v684_v38, 0.0  ;;  %1561 = vmatpush.bf16.msrb.mxu0 %v2278_v15  ;;  %v2292_v35 = vld [vmem:[%s2950_s3 + $0x88] sm:$0xff] }
 0x14a   :  { %v732_v43 = vpop.f32.mrf.mxu2  ;;  %1661 = vmatpush.bf16.msrb.mxu2 %v2292_v35 }
 0x14b   :  { %v733_v44 = vadd.f32 %v732_v43, %v2604_v4  ;;  %v781_v45 = vpop.f32.mrf.mxu3 }
 0x14c   :  { %v636_v22 = vpop.f32.mrf.mxu0 }
 0x14d   :  { %v782_v50 = vadd.f32 %v781_v45, %v733_v44  ;;  %v637_v46 = vadd.f32 %v636_v22, %v2596_v42  ;;  %v685_v12 = vpop.f32.mrf.mxu1 }
 0x14f   :  { %v686_v53 = vadd.f32 %v685_v12, %v637_v46  ;;  %v819_v3 = vmax.f32 %v782_v50, 0.0  ;;  %v2300_v50 = vld [vmem:[%s2950_s3 + $0xc8] sm:$0xff] }
 0x150   :  { %v2284_v46 = vld [vmem:[%s2950_s3 + $0x48] sm:$0xff]  ;;  %1710 = vmatpush.bf16.msrb.mxu3 %v2300_v50 }
 0x151   :  { %v820_v48 = vmax.f32 %v686_v53, 0.0  ;;  %1612 = vmatpush.bf16.msrb.mxu1 %v2284_v46 }
 0x152   :  { %v734_v54 = vpop.f32.mrf.mxu2 }
 0x153   :  { %v735_v55 = vadd.f32 %v734_v54, %v2604_v4  ;;  %v783_v57 = vpop.f32.mrf.mxu3  ;;  %v2695_v59 = vpack.c.bf16 %v820_v48, %v818_v23  ;;  %v2275_v23 = vld [vmem:[%s2950_s3] sm:$0xff] }
 0x154   :  { %v639_v61 = vpop.f32.mrf.mxu0  ;;  %v2283_v48 = vld [vmem:[%s2950_s3 + $0x40] sm:$0xff] }
 0x155   :  { %v784_v62 = vadd.f32 %v783_v57, %v735_v55  ;;  %v640_v0 = vadd.f32 %v639_v61, %v2596_v42  ;;  %v688_v1 = vpop.f32.mrf.mxu1  ;;  %1613 = vmatpush.bf16.msrb.mxu1 %v2283_v48 }
 0x157   :  { %v821_v5 = vmax.f32 %v784_v62, 0.0  ;;  %v689_v6 = vadd.f32 %v688_v1, %v640_v0  ;;  %1065 = vmatmul.bf16.gmra.mxu0 %v2544_v60  ;;  %1163 = vmatmul.bf16.gmra.mxu2 %v2544_v60  ;;  %v2291_v62 = vld [vmem:[%s2950_s3 + $0x80] sm:$0xff] }
 0x158   :  { %1114 = vmatmul.bf16.gmra.mxu1 %v2546_v63  ;;  %1212 = vmatmul.bf16.gmra.mxu3 %v2546_v63  ;;  %v2277_v63 = vld [vmem:[%s2950_s3 + $0x10] sm:$0xff] }
 0x159   :  { %v2705_v10 = vpack.c.bf16 %v821_v5, %v819_v3  ;;  %v822_v17 = vmax.f32 %v689_v6, 0.0  ;;  %1562 = vmatpush.bf16.msrb.mxu0 %v2277_v63  ;;  %1662 = vmatpush.bf16.msrb.mxu2 %v2291_v62 }
 0x15a   :  { %v737_v11 = vpop.f32.mrf.mxu2 }
 0x15b   :  { %v738_v13 = vadd.f32 %v737_v11, %v2604_v4  ;;  %v786_v2 = vpop.f32.mrf.mxu3 }
 0x15c   :  { %v641_v14 = vpop.f32.mrf.mxu0 }
 0x15d   :  { %v2708_v30 = vadd.f32 %v786_v2, %v738_v13  ;;  %v642_v60 = vadd.f32 %v641_v14, %v2596_v42  ;;  %v690_v16 = vpop.f32.mrf.mxu1 }
 0x15f   :  { %v691_v33 = vadd.f32 %v690_v16, %v642_v60 }
 0x161   :  { %v824_v18 = vmax.f32 %v691_v33, 0.0 }
 0x162   :  { %v2720_v20 = vpop.f32.mrf.mxu2 }
 0x163   :  { %v2722_v26 = vpop.f32.mrf.mxu3  ;;  %v2724_v27 = vpack.c.bf16 %v824_v18, %v822_v17 }
 0x164   :  { %v644_v29 = vpop.f32.mrf.mxu0 }
 0x165   :  { %v645_v31 = vadd.f32 %v644_v29, %v2596_v42  ;;  %v693_v32 = vpop.f32.mrf.mxu1 }
 0x167   :  { %v694_v34 = vadd.f32 %v693_v32, %v645_v31  ;;  %1070 = vmatmul.bf16.gmra.mxu0 %v2556_v49  ;;  %1168 = vmatmul.bf16.gmra.mxu2 %v2556_v49 }
 0x168   :  { %1119 = vmatmul.bf16.gmra.mxu1 %v2558_v51  ;;  %1217 = vmatmul.bf16.gmra.mxu3 %v2558_v51  ;;  %v2276_v51 = vld [vmem:[%s2950_s3 + $0x8] sm:$0xff] }
 0x169   :  { %v826_v12 = vmax.f32 %v694_v34, 0.0  ;;  %1563 = vmatpush.bf16.msrb.mxu0 %v2276_v51 }
 0x16a   :  { %v742_v36 = vpop.f32.mrf.mxu2 }
 0x16b   :  { %v743_v38 = vadd.f32 %v742_v36, %v2604_v4  ;;  %v791_v40 = vpop.f32.mrf.mxu3 }
 0x16c   :  { %v646_v43 = vpop.f32.mrf.mxu0 }
 0x16d   :  { %v2735_v44 = vadd.f32 %v791_v40, %v743_v38  ;;  %v647_v45 = vadd.f32 %v646_v43, %v2596_v42  ;;  %v695_v22 = vpop.f32.mrf.mxu1  ;;  %1564 = vmatpush.bf16.msrb.mxu0 %v2275_v23 }
 0x16f   :  { %v696_v49 = vadd.f32 %v695_v22, %v647_v45 }
 0x171   :  { %v828_v53 = vmax.f32 %v696_v49, 0.0 }
 0x172   :  { %v2747_v15 = vpop.f32.mrf.mxu2 }
 0x173   :  { %v2749_v47 = vpop.f32.mrf.mxu3  ;;  %v2757_v52 = vpack.c.bf16 %v828_v53, %v826_v12 }
 0x174   :  { %v649_v54 = vpop.f32.mrf.mxu0 }
 0x175   :  { %v650_v55 = vadd.f32 %v649_v54, %v2596_v42  ;;  %v698_v57 = vpop.f32.mrf.mxu1 }
 0x177   :  { %v699_v61 = vadd.f32 %v698_v57, %v650_v55  ;;  %1075 = vmatmul.bf16.gmra.mxu0 %v2568_v21  ;;  %1173 = vmatmul.bf16.gmra.mxu2 %v2568_v21 }
 0x178   :  { %1124 = vmatmul.bf16.gmra.mxu1 %v2570_v24  ;;  %1222 = vmatmul.bf16.gmra.mxu3 %v2570_v24  ;;  %v2299_v24 = vld [vmem:[%s2950_s3 + $0xc0] sm:$0xff] }
 0x179   :  { %v830_v13 = vmax.f32 %v699_v61, 0.0  ;;  %1711 = vmatpush.bf16.msrb.mxu3 %v2299_v24 }
 0x17a   :  { %v747_v0 = vpop.f32.mrf.mxu2 }
 0x17b   :  { %v748_v1 = vadd.f32 %v747_v0, %v2604_v4  ;;  %v796_v3 = vpop.f32.mrf.mxu3 }
 0x17c   :  { %v651_v5 = vpop.f32.mrf.mxu0 }
 0x17d   :  { %v2768_v6 = vadd.f32 %v796_v3, %v748_v1  ;;  %v652_v9 = vadd.f32 %v651_v5, %v2596_v42  ;;  %v700_v11 = vpop.f32.mrf.mxu1 }
 0x17f   :  { %v701_v21 = vadd.f32 %v700_v11, %v652_v9 }
 0x181   :  { %v832_v2 = vmax.f32 %v701_v21, 0.0 }
 0x182   :  { %v2774_v14 = vpop.f32.mrf.mxu2 }
 0x183   :  { %v2776_v60 = vpop.f32.mrf.mxu3  ;;  %v2778_v16 = vpack.c.bf16 %v832_v2, %v830_v13 }
 0x184   :  { %v654_v33 = vpop.f32.mrf.mxu0 }
 0x185   :  { %v655_v63 = vadd.f32 %v654_v33, %v2596_v42  ;;  %v703_v7 = vpop.f32.mrf.mxu1 }
 0x187   :  { %v704_v17 = vadd.f32 %v703_v7, %v655_v63  ;;  %1080 = vmatmul.bf16.gmra.mxu0 %v2583_v56  ;;  %1178 = vmatmul.bf16.gmra.mxu2 %v2583_v56  ;;  %v871_v56 = vld [vmem:[%s2951_s4 + $0x6] sm:$0x3] }
 0x188   :  { %1129 = vmatmul.bf16.gmra.mxu1 %v2588_v58  ;;  %1227 = vmatmul.bf16.gmra.mxu3 %v2588_v58  ;;  %v2798_v49 = vperm.slane %v871_v56, 0  ;;  %v2803_v46 = vperm.slane %v871_v56, 1 }
 0x189   :  { %v834_v38 = vmax.f32 %v704_v17, 0.0 }
 0x18a   :  { %v752_v18 = vpop.f32.mrf.mxu2 }
 0x18b   :  { %v753_v19 = vadd.f32 %v752_v18, %v2604_v4  ;;  %v801_v29 = vpop.f32.mrf.mxu3 }
 0x18c   :  { %v656_v31 = vpop.f32.mrf.mxu0 }
 0x18d   :  { %v2786_v32 = vadd.f32 %v801_v29, %v753_v19  ;;  %v657_v34 = vadd.f32 %v656_v31, %v2596_v42  ;;  %v705_v35 = vpop.f32.mrf.mxu1 }
 0x18f   :  { %v706_v36 = vadd.f32 %v705_v35, %v657_v34 }
 0x191   :  { %v836_v40 = vmax.f32 %v706_v36, 0.0 }
 0x192   :  { %v2789_v43 = vpop.f32.mrf.mxu2 }
 0x193   :  { %v2794_v58 = vpop.f32.mrf.mxu3  ;;  %v2796_v45 = vpack.c.bf16 %v836_v40, %v834_v38 }
 0x194   :  { %v1046_v22 = vpop.f32.mrf.mxu0 }
 0x195   :  { %v1095_v51 = vpop.f32.mrf.mxu1  ;;  %v1047_v42 = vadd.f32 %v1046_v22, %v2798_v49 }
 0x197   :  { %1565 = vmatmul.bf16.vlgmr.msrb.gmra.mxu0 %v2622_v25  ;;  %v1096_v23 = vadd.f32 %v1095_v51, %v1047_v42 }
 0x198   :  { %1614 = vmatmul.bf16.vlgmr.msrb.gmra.mxu1 %v2630_v37 }
 0x199   :  { %v1233_v61 = vmax.f32 %v1096_v23, 0.0 }
 0x19a   :  { %v1144_v50 = vpop.f32.mrf.mxu2 }
 0x19b   :  { %v1193_v12 = vpop.f32.mrf.mxu3  ;;  %v1145_v55 = vadd.f32 %v1144_v50, %v2803_v46 }
 0x19c   :  { %v1048_v53 = vpop.f32.mrf.mxu0 }
 0x19d   :  { %v1049_v48 = vadd.f32 %v1048_v53, %v2798_v49  ;;  %v1097_v54 = vpop.f32.mrf.mxu1  ;;  %v1194_v25 = vadd.f32 %v1193_v12, %v1145_v55 }
 0x19f   :  { %v1098_v57 = vadd.f32 %v1097_v54, %v1049_v48  ;;  %v1234_v21 = vmax.f32 %v1194_v25, 0.0 }
 0x1a1   :  { %v1235_v62 = vmax.f32 %v1098_v57, 0.0 }
 0x1a2   :  { %v1146_v0 = vpop.f32.mrf.mxu2 }
 0x1a3   :  { %v1267_v1 = vpack.c.bf16 %v1235_v62, %v1233_v61  ;;  %v1147_v37 = vadd.f32 %v1146_v0, %v2803_v46  ;;  %v1195_v3 = vpop.f32.mrf.mxu3 }
 0x1a4   :  { %v1051_v5 = vpop.f32.mrf.mxu0 }
 0x1a5   :  { %v1196_v9 = vadd.f32 %v1195_v3, %v1147_v37  ;;  %v1100_v11 = vpop.f32.mrf.mxu1  ;;  %1663 = vmatmul.bf16.vlgmr.msrb.gmra.mxu2 %v1267_v1  ;;  %v1052_v2 = vadd.f32 %v1051_v5, %v2798_v49 }
 0x1a7   :  { %v1236_v24 = vmax.f32 %v1196_v9, 0.0  ;;  %1570 = vmatmul.bf16.gmra.mxu0 %v2647_v39  ;;  %v1101_v17 = vadd.f32 %v1100_v11, %v1052_v2 }
 0x1a8   :  { %1619 = vmatmul.bf16.gmra.mxu1 %v2657_v8 }
 0x1a9   :  { %v1268_v13 = vpack.c.bf16 %v1236_v24, %v1234_v21  ;;  %v1237_v34 = vmax.f32 %v1101_v17, 0.0 }
 0x1aa   :  { %v1149_v33 = vpop.f32.mrf.mxu2 }
 0x1ab   :  { %v1198_v63 = vpop.f32.mrf.mxu3  ;;  %1712 = vmatmul.bf16.vlgmr.msrb.gmra.mxu3 %v1268_v13  ;;  %v1150_v29 = vadd.f32 %v1149_v33, %v2803_v46 }
 0x1ac   :  { %v1053_v7 = vpop.f32.mrf.mxu0 }
 0x1ad   :  { %v1054_v18 = vadd.f32 %v1053_v7, %v2798_v49  ;;  %v1102_v19 = vpop.f32.mrf.mxu1  ;;  %v1199_v39 = vadd.f32 %v1198_v63, %v1150_v29  ;;  %v740_v63 = vadd.f32 %v2720_v20, %v2604_v4 }
 0x1af   :  { %v1103_v31 = vadd.f32 %v1102_v19, %v1054_v18  ;;  %v1238_v42 = vmax.f32 %v1199_v39, 0.0 }
 0x1b1   :  { %v1239_v35 = vmax.f32 %v1103_v31, 0.0 }
 0x1b2   :  { %v1151_v36 = vpop.f32.mrf.mxu2 }
 0x1b3   :  { %v1152_v8 = vadd.f32 %v1151_v36, %v2803_v46  ;;  %v1200_v38 = vpop.f32.mrf.mxu3  ;;  %v1271_v40 = vpack.c.bf16 %v1239_v35, %v1237_v34  ;;  %v789_v34 = vadd.f32 %v2722_v26, %v740_v63 }
 0x1b4   :  { %v1056_v56 = vpop.f32.mrf.mxu0 }
 0x1b5   :  { %v1201_v22 = vadd.f32 %v1200_v38, %v1152_v8  ;;  %v1105_v51 = vpop.f32.mrf.mxu1  ;;  %1668 = vmatmul.bf16.gmra.mxu2 %v1271_v40  ;;  %v1057_v12 = vadd.f32 %v1056_v56, %v2798_v49  ;;  %v825_v39 = vmax.f32 %v789_v34, 0.0 }
 0x1b7   :  { %v1240_v50 = vmax.f32 %v1201_v22, 0.0  ;;  %1575 = vmatmul.bf16.gmra.mxu0 %v2671_v28  ;;  %v1106_v55 = vadd.f32 %v1105_v51, %v1057_v12  ;;  %v823_v22 = vmax.f32 %v2708_v30, 0.0 }
 0x1b8   :  { %1624 = vmatmul.bf16.gmra.mxu1 %v2681_v41 }
 0x1b9   :  { %v1272_v53 = vpack.c.bf16 %v1240_v50, %v1238_v42  ;;  %v1241_v25 = vmax.f32 %v1106_v55, 0.0  ;;  %v1282_v12 = vpack.c.bf16 %v825_v39, %v823_v22  ;;  %v831_v22 = vmax.f32 %v2768_v6, 0.0 }
 0x1ba   :  { %v1154_v23 = vpop.f32.mrf.mxu2 }
 0x1bb   :  { %v1203_v48 = vpop.f32.mrf.mxu3  ;;  %1717 = vmatmul.bf16.gmra.mxu3 %v1272_v53  ;;  %v1155_v62 = vadd.f32 %v1154_v23, %v2803_v46 }
 0x1bc   :  { %v1058_v54 = vpop.f32.mrf.mxu0 }
 0x1bd   :  { %v1059_v57 = vadd.f32 %v1058_v54, %v2798_v49  ;;  %v1107_v61 = vpop.f32.mrf.mxu1  ;;  %v1204_v28 = vadd.f32 %v1203_v48, %v1155_v62  ;;  %v745_v54 = vadd.f32 %v2747_v15, %v2604_v4 }
 0x1bf   :  { %v1108_v0 = vadd.f32 %v1107_v61, %v1059_v57  ;;  %v1242_v24 = vmax.f32 %v1204_v28, 0.0 }
 0x1c1   :  { %v1243_v1 = vmax.f32 %v1108_v0, 0.0 }
 0x1c2   :  { %v1156_v37 = vpop.f32.mrf.mxu2 }
 0x1c3   :  { %v1157_v41 = vadd.f32 %v1156_v37, %v2803_v46  ;;  %v1205_v3 = vpop.f32.mrf.mxu3  ;;  %v1275_v5 = vpack.c.bf16 %v1243_v1, %v1241_v25  ;;  %v794_v25 = vadd.f32 %v2749_v47, %v745_v54 }
 0x1c4   :  { %v1061_v9 = vpop.f32.mrf.mxu0 }
 0x1c5   :  { %v1206_v11 = vadd.f32 %v1205_v3, %v1157_v41  ;;  %v1110_v21 = vpop.f32.mrf.mxu1  ;;  %1673 = vmatmul.bf16.gmra.mxu2 %v1275_v5  ;;  %v1062_v2 = vadd.f32 %v1061_v9, %v2798_v49  ;;  %v829_v41 = vmax.f32 %v794_v25, 0.0 }
 0x1c7   :  { %v1244_v13 = vmax.f32 %v1206_v11, 0.0  ;;  %1580 = vmatmul.bf16.gmra.mxu0 %v2695_v59  ;;  %v1111_v19 = vadd.f32 %v1110_v21, %v1062_v2  ;;  %v827_v21 = vmax.f32 %v2735_v44, 0.0 }
 0x1c8   :  { %1629 = vmatmul.bf16.gmra.mxu1 %v2705_v10 }
 0x1c9   :  { %v1276_v33 = vpack.c.bf16 %v1244_v13, %v1242_v24  ;;  %v1245_v10 = vmax.f32 %v1111_v19, 0.0 }
 0x1ca   :  { %v1159_v7 = vpop.f32.mrf.mxu2 }
 0x1cb   :  { %v1208_v17 = vpop.f32.mrf.mxu3  ;;  %1722 = vmatmul.bf16.gmra.mxu3 %v1276_v33  ;;  %v1160_v59 = vadd.f32 %v1159_v7, %v2803_v46  ;;  %v1286_v33 = vpack.c.bf16 %v829_v41, %v827_v21 }
 0x1cc   :  { %v1063_v18 = vpop.f32.mrf.mxu0 }
 0x1cd   :  { %v1064_v29 = vadd.f32 %v1063_v18, %v2798_v49  ;;  %v1112_v31 = vpop.f32.mrf.mxu1  ;;  %v1209_v38 = vadd.f32 %v1208_v17, %v1160_v59  ;;  %v750_v18 = vadd.f32 %v2774_v14, %v2604_v4 }
 0x1cf   :  { %v1113_v35 = vadd.f32 %v1112_v31, %v1064_v29  ;;  %v1246_v26 = vmax.f32 %v1209_v38, 0.0 }
 0x1d1   :  { %v1247_v36 = vmax.f32 %v1113_v35, 0.0  ;;  %v799_v35 = vadd.f32 %v2776_v60, %v750_v18 }
 0x1d2   :  { %v1161_v8 = vpop.f32.mrf.mxu2 }
 0x1d3   :  { %v1162_v20 = vadd.f32 %v1161_v8, %v2803_v46  ;;  %v1210_v40 = vpop.f32.mrf.mxu3  ;;  %v1279_v56 = vpack.c.bf16 %v1247_v36, %v1245_v10  ;;  %v833_v8 = vmax.f32 %v799_v35, 0.0 }
 0x1d4   :  { %v1066_v51 = vpop.f32.mrf.mxu0 }
 0x1d5   :  { %v1211_v42 = vadd.f32 %v1210_v40, %v1162_v20  ;;  %v1115_v50 = vpop.f32.mrf.mxu1  ;;  %1678 = vmatmul.bf16.gmra.mxu2 %v1279_v56  ;;  %v1067_v23 = vadd.f32 %v1066_v51, %v2798_v49 }
 0x1d7   :  { %v1248_v53 = vmax.f32 %v1211_v42, 0.0  ;;  %1585 = vmatmul.bf16.gmra.mxu0 %v2724_v27  ;;  %v1116_v61 = vadd.f32 %v1115_v50, %v1067_v23 }
 0x1d8   :  { %1634 = vmatmul.bf16.gmra.mxu1 %v1282_v12  ;;  %v1290_v12 = vpack.c.bf16 %v833_v8, %v831_v22 }
 0x1d9   :  { %v1280_v48 = vpack.c.bf16 %v1248_v53, %v1246_v26  ;;  %v1249_v37 = vmax.f32 %v1116_v61, 0.0 }
 0x1da   :  { %v1164_v55 = vpop.f32.mrf.mxu2 }
 0x1db   :  { %v1213_v57 = vpop.f32.mrf.mxu3  ;;  %1727 = vmatmul.bf16.gmra.mxu3 %v1280_v48  ;;  %v1165_v1 = vadd.f32 %v1164_v55, %v2803_v46  ;;  %v755_v48 = vadd.f32 %v2789_v43, %v2604_v4 }
 0x1dc   :  { %v1068_v30 = vpop.f32.mrf.mxu0 }
 0x1dd   :  { %v1069_v62 = vadd.f32 %v1068_v30, %v2798_v49  ;;  %v1117_v0 = vpop.f32.mrf.mxu1  ;;  %v1214_v5 = vadd.f32 %v1213_v57, %v1165_v1 }
 0x1df   :  { %v1118_v27 = vadd.f32 %v1117_v0, %v1069_v62  ;;  %v1250_v47 = vmax.f32 %v1214_v5, 0.0  ;;  %v804_v62 = vadd.f32 %v2794_v58, %v755_v48 }
 0x1e1   :  { %v1251_v28 = vmax.f32 %v1118_v27, 0.0  ;;  %v837_v27 = vmax.f32 %v804_v62, 0.0 }
 0x1e2   :  { %v1166_v3 = vpop.f32.mrf.mxu2 }
 0x1e3   :  { %v1283_v9 = vpack.c.bf16 %v1251_v28, %v1249_v37  ;;  %v1167_v15 = vadd.f32 %v1166_v3, %v2803_v46  ;;  %v1215_v11 = vpop.f32.mrf.mxu3  ;;  %v835_v3 = vmax.f32 %v2786_v32, 0.0 }
 0x1e4   :  { %v1071_v24 = vpop.f32.mrf.mxu0 }
 0x1e5   :  { %v1216_v13 = vadd.f32 %v1215_v11, %v1167_v15  ;;  %v1120_v2 = vpop.f32.mrf.mxu1  ;;  %1683 = vmatmul.bf16.gmra.mxu2 %v1283_v9  ;;  %v1072_v17 = vadd.f32 %v1071_v24, %v2798_v49  ;;  %v1294_v11 = vpack.c.bf16 %v837_v27, %v835_v3 }
 0x1e7   :  { %v1252_v63 = vmax.f32 %v1216_v13, 0.0  ;;  %1590 = vmatmul.bf16.gmra.mxu0 %v2757_v52  ;;  %v1121_v31 = vadd.f32 %v1120_v2, %v1072_v17 }
 0x1e8   :  { %1639 = vmatmul.bf16.gmra.mxu1 %v1286_v33 }
 0x1e9   :  { %v1284_v7 = vpack.c.bf16 %v1252_v63, %v1250_v47  ;;  %v1253_v36 = vmax.f32 %v1121_v31, 0.0 }
 0x1ea   :  { %v1169_v19 = vpop.f32.mrf.mxu2 }
 0x1eb   :  { %v1218_v29 = vpop.f32.mrf.mxu3  ;;  %1732 = vmatmul.bf16.gmra.mxu3 %v1284_v7  ;;  %v1170_v10 = vadd.f32 %v1169_v19, %v2803_v46 }
 0x1ec   :  { %v1073_v44 = vpop.f32.mrf.mxu0 }
 0x1ed   :  { %v1074_v34 = vadd.f32 %v1073_v44, %v2798_v49  ;;  %v1122_v59 = vpop.f32.mrf.mxu1  ;;  %v1219_v20 = vadd.f32 %v1218_v29, %v1170_v10 }
 0x1ef   :  { %v1123_v52 = vadd.f32 %v1122_v59, %v1074_v34  ;;  %v1254_v60 = vmax.f32 %v1219_v20, 0.0  ;;  %v2865_v20 = vld [vmem:[%s2951_s4 + $0x8] ss:$0 sm:$0xff] }
 0x1f1   :  { %v1255_v39 = vmax.f32 %v1123_v52, 0.0 }
 0x1f2   :  { %v1171_v38 = vpop.f32.mrf.mxu2 }
 0x1f3   :  { %v1287_v40 = vpack.c.bf16 %v1255_v39, %v1253_v36  ;;  %v1172_v14 = vadd.f32 %v1171_v38, %v2803_v46  ;;  %v1220_v56 = vpop.f32.mrf.mxu3 }
 0x1f4   :  { %v1076_v51 = vpop.f32.mrf.mxu0 }
 0x1f5   :  { %v1221_v42 = vadd.f32 %v1220_v56, %v1172_v14  ;;  %v1125_v50 = vpop.f32.mrf.mxu1  ;;  %1688 = vmatmul.bf16.gmra.mxu2 %v1287_v40  ;;  %v1077_v23 = vadd.f32 %v1076_v51, %v2798_v49 }
 0x1f7   :  { %v1256_v26 = vmax.f32 %v1221_v42, 0.0  ;;  %1595 = vmatmul.bf16.gmra.mxu0 %v2778_v16  ;;  %v1126_v57 = vadd.f32 %v1125_v50, %v1077_v23 }
 0x1f8   :  { %1644 = vmatmul.bf16.gmra.mxu1 %v1290_v12 }
 0x1f9   :  { %v1288_v53 = vpack.c.bf16 %v1256_v26, %v1254_v60  ;;  %v1257_v25 = vmax.f32 %v1126_v57, 0.0 }
 0x1fa   :  { %v1174_v54 = vpop.f32.mrf.mxu2 }
 0x1fb   :  { %v1223_v55 = vpop.f32.mrf.mxu3  ;;  %1737 = vmatmul.bf16.gmra.mxu3 %v1288_v53  ;;  %v1175_v0 = vadd.f32 %v1174_v54, %v2803_v46 }
 0x1fc   :  { %v1078_v6 = vpop.f32.mrf.mxu0 }
 0x1fd   :  { %v1079_v30 = vadd.f32 %v1078_v6, %v2798_v49  ;;  %v1127_v61 = vpop.f32.mrf.mxu1  ;;  %v1224_v28 = vadd.f32 %v1223_v55, %v1175_v0 }
 0x1ff   :  { %v1128_v16 = vadd.f32 %v1127_v61, %v1079_v30  ;;  %v1258_v58 = vmax.f32 %v1224_v28, 0.0 }
 0x201   :  { %v1259_v1 = vmax.f32 %v1128_v16, 0.0 }
 0x202   :  { %v1176_v37 = vpop.f32.mrf.mxu2 }
 0x203   :  { %v1291_v41 = vpack.c.bf16 %v1259_v1, %v1257_v25  ;;  %v1177_v4 = vadd.f32 %v1176_v37, %v2803_v46  ;;  %v1225_v43 = vpop.f32.mrf.mxu3 }
 0x204   :  { %v1081_v5 = vpop.f32.mrf.mxu0 }
 0x205   :  { %v1226_v9 = vadd.f32 %v1225_v43, %v1177_v4  ;;  %v1130_v15 = vpop.f32.mrf.mxu1  ;;  %1693 = vmatmul.bf16.gmra.mxu2 %v1291_v41  ;;  %v1082_v13 = vadd.f32 %v1081_v5, %v2798_v49 }
 0x207   :  { %v1260_v21 = vmax.f32 %v1226_v9, 0.0  ;;  %1600 = vmatmul.bf16.gmra.mxu0 %v2796_v45  ;;  %v1131_v63 = vadd.f32 %v1130_v15, %v1082_v13 }
 0x208   :  { %1649 = vmatmul.bf16.gmra.mxu1 %v1294_v11 }
 0x209   :  { %v1292_v24 = vpack.c.bf16 %v1260_v21, %v1258_v58  ;;  %v1261_v19 = vmax.f32 %v1131_v63, 0.0 }
 0x20a   :  { %v1179_v2 = vpop.f32.mrf.mxu2 }
 0x20b   :  { %v1228_v33 = vpop.f32.mrf.mxu3  ;;  %1742 = vmatmul.bf16.gmra.mxu3 %v1292_v24  ;;  %v1180_v17 = vadd.f32 %v1179_v2, %v2803_v46 }
 0x20c   :  { %v1083_v47 = vpop.f32.mrf.mxu0 }
 0x20d   :  { %v1084_v32 = vadd.f32 %v1083_v47, %v2798_v49  ;;  %v1132_v7 = vpop.f32.mrf.mxu1  ;;  %v1229_v31 = vadd.f32 %v1228_v33, %v1180_v17 }
 0x20f   :  { %v1133_v18 = vadd.f32 %v1132_v7, %v1084_v32  ;;  %v1262_v36 = vmax.f32 %v1229_v31, 0.0 }
 0x211   :  { %v1263_v29 = vmax.f32 %v1133_v18, 0.0 }
 0x212   :  { %v1181_v44 = vpop.f32.mrf.mxu2 }
 0x213   :  { %v1295_v45 = vpack.c.bf16 %v1263_v29, %v1261_v19  ;;  %v1182_v34 = vadd.f32 %v1181_v44, %v2803_v46  ;;  %v1230_v59 = vpop.f32.mrf.mxu3 }
 0x214   :  { %v1566_v35 = vpop.f32.mrf.mxu0 }
 0x215   :  { %v1231_v10 = vadd.f32 %v1230_v59, %v1182_v34  ;;  %v1615_v52 = vpop.f32.mrf.mxu1  ;;  %1698 = vmatmul.bf16.gmra.mxu2 %v1295_v45  ;;  %v1567_v46 = vadd.f32 %v2865_v20, %v1566_v35 }
 0x217   :  { %v1264_v39 = vmax.f32 %v1231_v10, 0.0  ;;  %v1616_v22 = vadd.f32 %v1615_v52, %v1567_v46 }
 0x219   :  { %v1296_v8 = vpack.c.bf16 %v1264_v39, %v1262_v36 }
 0x21b   :  { %1747 = vmatmul.bf16.gmra.mxu3 %v1296_v8 }
 0x21c   :  { %v1568_v49 = vpop.f32.mrf.mxu0 }
 0x21d   :  { %v1617_v38 = vpop.f32.mrf.mxu1  ;;  %v1569_v60 = vadd.f32 %v2865_v20, %v1568_v49 }
 0x21f   :  { %v1618_v23 = vadd.f32 %v1617_v38, %v1569_v60 }
 0x224   :  { %v1571_v40 = vpop.f32.mrf.mxu0 }
 0x225   :  { %v1620_v14 = vpop.f32.mrf.mxu1  ;;  %v1572_v57 = vadd.f32 %v2865_v20, %v1571_v40 }
 0x227   :  { %v1621_v62 = vadd.f32 %v1620_v14, %v1572_v57 }
 0x228   :  { %v1664_v56 = vpop.f32.mrf.mxu2 }
 0x229   :  { %v1665_v42 = vadd.f32 %v1664_v56, %v1616_v22 }
 0x22c   :  { %v1573_v51 = vpop.f32.mrf.mxu0 }
 0x22d   :  { %v1622_v50 = vpop.f32.mrf.mxu1  ;;  %v1574_v27 = vadd.f32 %v2865_v20, %v1573_v51 }
 0x22e   :  { %v1713_v12 = vpop.f32.mrf.mxu3 }
 0x22f   :  { %v1714_v26 = vadd.f32 %v1713_v12, %v1665_v42  ;;  %v1623_v41 = vadd.f32 %v1622_v50, %v1574_v27 }
 0x230   :  { %v1666_v53 = vpop.f32.mrf.mxu2 }
 0x231   :  { %1754 = vst.msk [vmem:[%s2952_s5] sm:$0xff] %vm1753_vm1, %v1714_v26  ;;  %v1667_v54 = vadd.f32 %v1666_v53, %v1618_v23 }
 0x234   :  { %v1576_v48 = vpop.f32.mrf.mxu0 }
 0x235   :  { %v1625_v55 = vpop.f32.mrf.mxu1  ;;  %v1577_v5 = vadd.f32 %v2865_v20, %v1576_v48 }
 0x236   :  { %v1715_v6 = vpop.f32.mrf.mxu3 }
 0x237   :  { %v1716_v30 = vadd.f32 %v1715_v6, %v1667_v54  ;;  %v1626_v58 = vadd.f32 %v1625_v55, %v1577_v5 }
 0x238   :  { %v1669_v61 = vpop.f32.mrf.mxu2 }
 0x239   :  { %1755 = vst.msk [vmem:[%s2952_s5 + $0x8] sm:$0xff] %vm1753_vm1, %v1716_v30  ;;  %v1670_v16 = vadd.f32 %v1669_v61, %v1621_v62 }
 0x23c   :  { %v1578_v0 = vpop.f32.mrf.mxu0 }
 0x23d   :  { %v1627_v25 = vpop.f32.mrf.mxu1  ;;  %v1579_v2 = vadd.f32 %v2865_v20, %v1578_v0 }
 0x23e   :  { %v1718_v1 = vpop.f32.mrf.mxu3 }
 0x23f   :  { %v1719_v37 = vadd.f32 %v1718_v1, %v1670_v16  ;;  %v1628_v32 = vadd.f32 %v1627_v25, %v1579_v2 }
 0x240   :  { %v1671_v28 = vpop.f32.mrf.mxu2 }
 0x241   :  { %1756 = vst.msk [vmem:[%s2952_s5 + $0x10] sm:$0xff] %vm1753_vm1, %v1719_v37  ;;  %v1672_v43 = vadd.f32 %v1671_v28, %v1623_v41 }
 0x244   :  { %v1581_v4 = vpop.f32.mrf.mxu0 }
 0x245   :  { %v1630_v15 = vpop.f32.mrf.mxu1  ;;  %v1582_v19 = vadd.f32 %v2865_v20, %v1581_v4 }
 0x246   :  { %v1720_v3 = vpop.f32.mrf.mxu3 }
 0x247   :  { %v1721_v9 = vadd.f32 %v1720_v3, %v1672_v43  ;;  %v1631_v31 = vadd.f32 %v1630_v15, %v1582_v19 }
 0x248   :  { %v1674_v11 = vpop.f32.mrf.mxu2 }
 0x249   :  { %1757 = vst.msk [vmem:[%s2952_s5 + $0x18] sm:$0xff] %vm1753_vm1, %v1721_v9  ;;  %v1675_v24 = vadd.f32 %v1674_v11, %v1626_v58 }
 0x24c   :  { %v1583_v21 = vpop.f32.mrf.mxu0 }
 0x24d   :  { %v1632_v63 = vpop.f32.mrf.mxu1  ;;  %v1584_v35 = vadd.f32 %v2865_v20, %v1583_v21 }
 0x24e   :  { %v1723_v13 = vpop.f32.mrf.mxu3 }
 0x24f   :  { %v1724_v33 = vadd.f32 %v1723_v13, %v1675_v24  ;;  %v1633_v39 = vadd.f32 %v1632_v63, %v1584_v35 }
 0x250   :  { %v1676_v47 = vpop.f32.mrf.mxu2 }
 0x251   :  { %1758 = vst.msk [vmem:[%s2952_s5 + $0x20] sm:$0xff] %vm1753_vm1, %v1724_v33  ;;  %v1677_v7 = vadd.f32 %v1676_v47, %v1628_v32 }
 0x254   :  { %v1586_v17 = vpop.f32.mrf.mxu0 }
 0x255   :  { %v1635_v45 = vpop.f32.mrf.mxu1  ;;  %v1587_v40 = vadd.f32 %v2865_v20, %v1586_v17 }
 0x256   :  { %v1725_v18 = vpop.f32.mrf.mxu3 }
 0x257   :  { %v1726_v29 = vadd.f32 %v1725_v18, %v1677_v7  ;;  %v1636_v22 = vadd.f32 %v1635_v45, %v1587_v40 }
 0x258   :  { %v1679_v44 = vpop.f32.mrf.mxu2 }
 0x259   :  { %1759 = vst.msk [vmem:[%s2952_s5 + $0x28] sm:$0xff] %vm1753_vm1, %v1726_v29  ;;  %v1680_v34 = vadd.f32 %v1679_v44, %v1631_v31 }
 0x25c   :  { %v1588_v52 = vpop.f32.mrf.mxu0 }
 0x25d   :  { %v1637_v49 = vpop.f32.mrf.mxu1  ;;  %v1589_v50 = vadd.f32 %v2865_v20, %v1588_v52 }
 0x25e   :  { %v1728_v59 = vpop.f32.mrf.mxu3 }
 0x25f   :  { %v1729_v10 = vadd.f32 %v1728_v59, %v1680_v34  ;;  %v1638_v53 = vadd.f32 %v1637_v49, %v1589_v50 }
 0x260   :  { %v1681_v36 = vpop.f32.mrf.mxu2 }
 0x261   :  { %1760 = vst.msk [vmem:[%s2952_s5 + $0x30] sm:$0xff] %vm1753_vm1, %v1729_v10  ;;  %v1682_v8 = vadd.f32 %v1681_v36, %v1633_v39 }
 0x264   :  { %v1591_v56 = vpop.f32.mrf.mxu0 }
 0x265   :  { %v1640_v60 = vpop.f32.mrf.mxu1  ;;  %v1592_v55 = vadd.f32 %v2865_v20, %v1591_v56 }
 0x266   :  { %v1730_v38 = vpop.f32.mrf.mxu3 }
 0x267   :  { %v1731_v14 = vadd.f32 %v1730_v38, %v1682_v8  ;;  %v1641_v61 = vadd.f32 %v1640_v60, %v1592_v55 }
 0x268   :  { %v1684_v46 = vpop.f32.mrf.mxu2 }
 0x269   :  { %1761 = vst.msk [vmem:[%s2952_s5 + $0x38] sm:$0xff] %vm1753_vm1, %v1731_v14  ;;  %v1685_v51 = vadd.f32 %v1684_v46, %v1636_v22 }
 0x26c   :  { %v1593_v23 = vpop.f32.mrf.mxu0 }
 0x26d   :  { %v1642_v30 = vpop.f32.mrf.mxu1  ;;  %v1594_v25 = vadd.f32 %v2865_v20, %v1593_v23 }
 0x26e   :  { %v1733_v42 = vpop.f32.mrf.mxu3 }
 0x26f   :  { %v1734_v12 = vadd.f32 %v1733_v42, %v1685_v51  ;;  %v1643_v37 = vadd.f32 %v1642_v30, %v1594_v25 }
 0x270   :  { %v1686_v26 = vpop.f32.mrf.mxu2 }
 0x271   :  { %1762 = vst.msk [vmem:[%s2952_s5 + $0x40] sm:$0xff] %vm1753_vm1, %v1734_v12  ;;  %v1687_v48 = vadd.f32 %v1686_v26, %v1638_v53 }
 0x274   :  { %v1596_v0 = vpop.f32.mrf.mxu0 }
 0x275   :  { %v1645_v28 = vpop.f32.mrf.mxu1  ;;  %v1597_v43 = vadd.f32 %v2865_v20, %v1596_v0 }
 0x276   :  { %v1735_v54 = vpop.f32.mrf.mxu3 }
 0x277   :  { %v1736_v6 = vadd.f32 %v1735_v54, %v1687_v48  ;;  %v1646_v15 = vadd.f32 %v1645_v28, %v1597_v43 }
 0x278   :  { %v1689_v57 = vpop.f32.mrf.mxu2 }
 0x279   :  { %1763 = vst.msk [vmem:[%s2952_s5 + $0x48] sm:$0xff] %vm1753_vm1, %v1736_v6  ;;  %v1690_v62 = vadd.f32 %v1689_v57, %v1641_v61 }
 0x27c   :  { %v1598_v5 = vpop.f32.mrf.mxu0 }
 0x27d   :  { %v1647_v58 = vpop.f32.mrf.mxu1  ;;  %v1599_v24 = vadd.f32 %v2865_v20, %v1598_v5 }
 0x27e   :  { %v1738_v16 = vpop.f32.mrf.mxu3 }
 0x27f   :  { %v1739_v1 = vadd.f32 %v1738_v16, %v1690_v62  ;;  %v1648_v47 = vadd.f32 %v1647_v58, %v1599_v24 }
 0x280   :  { %v1691_v27 = vpop.f32.mrf.mxu2 }
 0x281   :  { %1764 = vst.msk [vmem:[%s2952_s5 + $0x50] sm:$0xff] %vm1753_vm1, %v1739_v1  ;;  %v1692_v41 = vadd.f32 %v1691_v27, %v1643_v37 }
 0x284   :  { %v1601_v33 = vpop.f32.mrf.mxu0 }
 0x285   :  { %v1602_v7 = vadd.f32 %v2865_v20, %v1601_v33  ;;  %v1650_v18 = vpop.f32.mrf.mxu1 }
 0x286   :  { %v1740_v4 = vpop.f32.mrf.mxu3 }
 0x287   :  { %v1741_v3 = vadd.f32 %v1740_v4, %v1692_v41  ;;  %v1651_v29 = vadd.f32 %v1650_v18, %v1602_v7 }
 0x288   :  { %v1694_v9 = vpop.f32.mrf.mxu2 }
 0x289   :  { %1765 = vst.msk [vmem:[%s2952_s5 + $0x58] sm:$0xff] %vm1753_vm1, %v1741_v3  ;;  %v1695_v11 = vadd.f32 %v1694_v9, %v1646_v15 }
 0x28c   :  { %v1603_v44 = vpop.f32.mrf.mxu0 }
 0x28d   :  { %v1604_v34 = vadd.f32 %v2865_v20, %v1603_v44  ;;  %v1652_v35 = vpop.f32.mrf.mxu1 }
 0x28e   :  { %v1743_v21 = vpop.f32.mrf.mxu3 }
 0x28f   :  { %v1744_v13 = vadd.f32 %v1743_v21, %v1695_v11  ;;  %v1653_v52 = vadd.f32 %v1652_v35, %v1604_v34 }
 0x290   :  { %v1696_v2 = vpop.f32.mrf.mxu2 }
 0x291   :  { %1766 = vst.msk [vmem:[%s2952_s5 + $0x60] sm:$0xff] %vm1753_vm1, %v1744_v13  ;;  %v1697_v63 = vadd.f32 %v1696_v2, %v1648_v47 }
 0x296   :  { %v1745_v32 = vpop.f32.mrf.mxu3 }
 0x297   :  { %v1746_v17 = vadd.f32 %v1745_v32, %v1697_v63 }
 0x298   :  { %v1699_v19 = vpop.f32.mrf.mxu2 }
 0x299   :  { %1767 = vst.msk [vmem:[%s2952_s5 + $0x68] sm:$0xff] %vm1753_vm1, %v1746_v17  ;;  %v1700_v31 = vadd.f32 %v1699_v19, %v1651_v29 }
 0x29e   :  { %v1748_v45 = vpop.f32.mrf.mxu3 }
 0x29f   :  { %v1749_v59 = vadd.f32 %v1748_v45, %v1700_v31 }
 0x2a0   :  { %v1701_v10 = vpop.f32.mrf.mxu2 }
 0x2a1   :  { %1768 = vst.msk [vmem:[%s2952_s5 + $0x70] sm:$0xff] %vm1753_vm1, %v1749_v59  ;;  %v1702_v36 = vadd.f32 %v1701_v10, %v1653_v52 }
 0x2a6   :  { %v1750_v39 = vpop.f32.mrf.mxu3 }
 0x2a7   :  { %v1751_v8 = vadd.f32 %v1750_v39, %v1702_v36 }
 0x2a9   :  { %1769 = vst.msk [vmem:[%s2952_s5 + $0x78] sm:$0xff] %vm1753_vm1, %v1751_v8 }
 0x2aa   :  { %1774 = vsyncpa [#allocation3], 1 }

</bundles_post_ra>
